<compile_context>
chip_gen: v7x
topology: tpu7x:2x2x1
jax: 0.10.0
libtpu: 0.0.40
codegen_flags: <defaults>
</compile_context>

<pallas_src>
import jax
import jax.numpy as jnp
from jax import lax
from jax.experimental import pallas as pl
from jax.experimental.pallas import tpu as pltpu


_UNROLL_LIMIT = 32  # fully unroll the time loop when T <= this


def _make_lstm_fc_kernel(T, Bp, H):
    """Build the kernel for static (T, padded batch Bp, hidden H)."""

    def kernel(x_ref,      # [T*Bp, D_in]  time-major input, batch padded to Bp
               wih0_ref,   # [D_in, 4H]    layer-0 input weights (pre-transposed)
               b0_ref,     # [1, 4H]       layer-0 bias (b_ih + b_hh)
               whh0_ref,   # [H, 4H]       layer-0 recurrent weights
               w1_ref,     # [2H, 4H]      layer-1 fused weights concat([W_ih1; W_hh1])
               b1_ref,     # [1, 4H]       layer-1 bias (b_ih + b_hh)
               wfc_ref,    # [H, NK]       fc weight (pre-transposed)
               bfc_ref,    # [1, NK]       fc bias
               out_ref,    # [Bp, NK]
               xg_s):      # VMEM scratch [T*Bp, 4H] — precomputed layer-0 input gates
        f32 = jnp.float32

        # (1) Hoisted layer-0 input projection: ONE matmul for all timesteps.
        xg_s[...] = (jnp.dot(x_ref[...], wih0_ref[...],
                             preferred_element_type=f32) + b0_ref[...])

        # (2) Weights read once; live in vregs across the whole recurrence.
        whh0 = whh0_ref[...]
        w1 = w1_ref[...]
        b1 = b1_ref[...]

        def gates_to_hc(gates, c_prev):
            # Two full-width EUP passes; static lane slices pick i/f/g/o (PyTorch order).
            sg = jax.nn.sigmoid(gates)
            tg = jnp.tanh(gates)
            i = sg[:, 0 * H:1 * H]
            f = sg[:, 1 * H:2 * H]
            g = tg[:, 2 * H:3 * H]
            o = sg[:, 3 * H:4 * H]
            c_new = f * c_prev + i * g
            h_new = o * jnp.tanh(c_new)
            return h_new, c_new

        def x_slab(t):
            if isinstance(t, int):                 # unrolled path: fully static slice
                return xg_s[t * Bp:(t + 1) * Bp, :]
            start = pl.multiple_of(t * Bp, Bp)     # dynamic path: aligned dynamic slice
            return xg_s[pl.ds(start, Bp), :]

        def step(t, carry):
            h0, c0, h1, c1 = carry
            # layer 0: only the recurrent matmul remains on the serial critical path
            g0 = x_slab(t) + jnp.dot(h0, whh0, preferred_element_type=f32)
            h0, c0 = gates_to_hc(g0, c0)
            # layer 1: single fused matmul on [h0_new | h1_prev]
            g1 = jnp.dot(jnp.concatenate([h0, h1], axis=1), w1,
                         preferred_element_type=f32) + b1
            h1, c1 = gates_to_hc(g1, c1)
            return (h0, c0, h1, c1)

        z = jnp.zeros((Bp, H), f32)
        carry = (z, z, z, z)                       # zero init h/c (matches torch.zeros)
        if T <= _UNROLL_LIMIT:
            for t in range(T):                     # full unroll for small fixed T
                carry = step(t, carry)
        else:
            carry = lax.fori_loop(0, T, step, carry)

        h1_last = carry[2]
        out_ref[...] = (jnp.dot(h1_last, wfc_ref[...],
                                preferred_element_type=f32)
                        + bfc_ref[...]).astype(out_ref.dtype)

    return kernel


def _lstm_model_forward(x, params):
    """x: [B, T, D_in] float32 (batch_first). Returns [B, num_keys] float32."""
    B, T, D_in = x.shape
    H = params["whh0"].shape[0]
    NK = params["wfc"].shape[1]
    Bp = ((B + 7) // 8) * 8                        # pad batch to the f32 sublane multiple

    # Time-major, batch-padded, flattened to [T*Bp, D_in] so the layer-0 input
    # projection is a single big matmul and per-step slabs are 8-row aligned.
    x_tm = jnp.transpose(x, (1, 0, 2))
    if Bp != B:
        x_tm = jnp.pad(x_tm, ((0, 0), (0, Bp - B), (0, 0)))
    x2d = x_tm.reshape(T * Bp, D_in)
    # TODO(synk): for large B*T, stream x over a grid-on-T with BlockSpec (and bf16
    # weight storage on v6e/v7x) instead of keeping the whole sequence VMEM-resident.

    vmem = pl.BlockSpec(memory_space=pltpu.MemorySpace.VMEM)
    out = pl.pallas_call(
        _make_lstm_fc_kernel(T, Bp, H),
        out_shape=jax.ShapeDtypeStruct((Bp, NK), jnp.float32),
        in_specs=[vmem] * 8,
        out_specs=vmem,
        scratch_shapes=[pltpu.VMEM((T * Bp, 4 * H), jnp.float32)],
    )(x2d,
      params["wih0"], params["b0"], params["whh0"],
      params["w1cat"], params["b1"],
      params["wfc"], params["bfc"])
    return out[:B]


lstm_model_forward = jax.jit(_lstm_model_forward)


def init_params(key, input_size, hidden_size, num_keys):
    """Deterministic init mimicking PyTorch LSTM/Linear uniform(-1/sqrt(H), 1/sqrt(H))."""
    H = hidden_size
    k = 1.0 / jnp.sqrt(jnp.float32(H))
    keys = jax.random.split(key, 10)

    def u(k_, shape):
        return jax.random.uniform(k_, shape, jnp.float32, -k, k)

    # PyTorch stores W_ih as [4H, D]; pre-transpose to [D, 4H] for x @ W.
    wih0 = u(keys[0], (4 * H, input_size)).T
    whh0 = u(keys[1], (4 * H, H)).T
    b0 = (u(keys[2], (4 * H,)) + u(keys[3], (4 * H,))).reshape(1, 4 * H)   # b_ih + b_hh
    wih1 = u(keys[4], (4 * H, H)).T
    whh1 = u(keys[5], (4 * H, H)).T
    b1 = (u(keys[6], (4 * H,)) + u(keys[7], (4 * H,))).reshape(1, 4 * H)
    wfc = u(keys[8], (num_keys, H)).T                                      # [H, num_keys]
    bfc = u(keys[9], (num_keys,)).reshape(1, num_keys)
    w1cat = jnp.concatenate([wih1, whh1], axis=0)                          # [2H, 4H]
    return dict(wih0=wih0, whh0=whh0, b0=b0,
                wih1=wih1, whh1=whh1, b1=b1, w1cat=w1cat,
                wfc=wfc, bfc=bfc)


def _reference_forward(x, params):
    """Pure-JAX reference (unfused formulation) for a sanity check."""
    B, T, _ = x.shape
    H = params["whh0"].shape[0]

    def cell(x_t, h, c, wih, whh, b):
        gates = x_t @ wih + h @ whh + b
        i = jax.nn.sigmoid(gates[:, 0 * H:1 * H])
        f = jax.nn.sigmoid(gates[:, 1 * H:2 * H])
        g = jnp.tanh(gates[:, 2 * H:3 * H])
        o = jax.nn.sigmoid(gates[:, 3 * H:4 * H])
        c = f * c + i * g
        h = o * jnp.tanh(c)
        return h, c

    h0 = c0 = h1 = c1 = jnp.zeros((B, H), jnp.float32)
    for t in range(T):
        h0, c0 = cell(x[:, t, :], h0, c0, params["wih0"], params["whh0"], params["b0"])
        h1, c1 = cell(h0, h1, c1, params["wih1"], params["whh1"], params["b1"])
    return h1 @ params["wfc"] + params["bfc"]


if __name__ == "__main__":
    # Small shapes consistent with the module: input_size = classes_num,
    # hidden_size = 2 * classes_num, num_keys = classes_num, 2 layers.
    B, T = 2, 8
    input_size = 16
    hidden_size = 2 * input_size       # 32
    num_keys = input_size              # 16

    key = jax.random.PRNGKey(0)
    kx, kp = jax.random.split(key)
    x = jax.random.normal(kx, (B, T, input_size), jnp.float32)
    params = init_params(kp, input_size, hidden_size, num_keys)

    y = lstm_model_forward(x, params)
    y = jax.block_until_ready(y)

    y_ref = _reference_forward(x, params)
    assert y.shape == (B, num_keys)
    assert jnp.allclose(y, y_ref, atol=2e-5, rtol=2e-5), "mismatch vs pure-JAX reference"

    print("KERNEL_OK")
</pallas_src>

<mosaic_0001>
module attributes {stable_mosaic.version = 11 : i64} {
  func.func @kernel(%arg0: memref<64x16xf32, #tpu.memory_space<vmem>>, %arg1: memref<16x128xf32, #tpu.memory_space<vmem>>, %arg2: memref<1x128xf32, #tpu.memory_space<vmem>>, %arg3: memref<32x128xf32, #tpu.memory_space<vmem>>, %arg4: memref<64x128xf32, #tpu.memory_space<vmem>>, %arg5: memref<1x128xf32, #tpu.memory_space<vmem>>, %arg6: memref<32x16xf32, #tpu.memory_space<vmem>>, %arg7: memref<1x16xf32, #tpu.memory_space<vmem>>, %arg8: memref<8x16xf32, #tpu.memory_space<vmem>>, %arg9: memref<64x128xf32, #tpu.memory_space<vmem>>) attributes {dimension_semantics = [], scalar_prefetch = 0 : i64, scratch_operands = 1 : i64, tpu.core_type = #tpu.core_type<tc>} {
    %c0 = arith.constant 0 : index
    %c0_0 = arith.constant 0 : index
    %0 = vector.load %arg0[%c0, %c0_0] : memref<64x16xf32, #tpu.memory_space<vmem>>, vector<64x16xf32>
    %c0_1 = arith.constant 0 : index
    %c0_2 = arith.constant 0 : index
    %1 = vector.load %arg1[%c0_1, %c0_2] : memref<16x128xf32, #tpu.memory_space<vmem>>, vector<16x128xf32>
    %cst = arith.constant dense<0.000000e+00> : vector<64x128xf32>
    %2 = tpu.matmul %0, %1, %cst {dimension_numbers = #tpu.dot_dimension_numbers<[1], [0], [0], [1], [0, 0, 1, 1], [], []>} : vector<64x16xf32>, vector<16x128xf32>, vector<64x128xf32> -> vector<64x128xf32>
    %c0_3 = arith.constant 0 : index
    %c0_4 = arith.constant 0 : index
    %3 = vector.load %arg2[%c0_3, %c0_4] : memref<1x128xf32, #tpu.memory_space<vmem>>, vector<1x128xf32>
    %4 = vector.broadcast %3 : vector<1x128xf32> to vector<64x128xf32>
    %5 = arith.addf %2, %4 : vector<64x128xf32>
    %c0_5 = arith.constant 0 : index
    %c0_6 = arith.constant 0 : index
    %6 = vector.load %arg9[%c0_5, %c0_6] : memref<64x128xf32, #tpu.memory_space<vmem>>, vector<64x128xf32>
    tpu.vector_store %arg9[%c0_5, %c0_6], %5 {strides = array<i32>} : memref<64x128xf32, #tpu.memory_space<vmem>>, vector<64x128xf32>,
    %c0_7 = arith.constant 0 : index
    %c0_8 = arith.constant 0 : index
    %7 = vector.load %arg3[%c0_7, %c0_8] : memref<32x128xf32, #tpu.memory_space<vmem>>, vector<32x128xf32>
    %c0_9 = arith.constant 0 : index
    %c0_10 = arith.constant 0 : index
    %8 = vector.load %arg4[%c0_9, %c0_10] : memref<64x128xf32, #tpu.memory_space<vmem>>, vector<64x128xf32>
    %c0_11 = arith.constant 0 : index
    %c0_12 = arith.constant 0 : index
    %9 = vector.load %arg5[%c0_11, %c0_12] : memref<1x128xf32, #tpu.memory_space<vmem>>, vector<1x128xf32>
    %cst_13 = arith.constant 0.000000e+00 : f32
    %10 = vector.broadcast %cst_13 : f32 to vector<8x32xf32>
    %c0_14 = arith.constant 0 : index
    %c0_15 = arith.constant 0 : index
    %11 = vector.load %arg9[%c0_14, %c0_15] : memref<64x128xf32, #tpu.memory_space<vmem>>, vector<8x128xf32>
    %cst_16 = arith.constant dense<0.000000e+00> : vector<8x128xf32>
    %12 = tpu.matmul %10, %7, %cst_16 {dimension_numbers = #tpu.dot_dimension_numbers<[1], [0], [0], [1], [0, 0, 1, 1], [], []>} : vector<8x32xf32>, vector<32x128xf32>, vector<8x128xf32> -> vector<8x128xf32>
    %13 = arith.addf %11, %12 : vector<8x128xf32>
    %14 = arith.negf %13 : vector<8x128xf32>
    %15 = math.exp %14 : vector<8x128xf32>
    %cst_17 = arith.constant 1.000000e+00 : f32
    %16 = vector.broadcast %cst_17 : f32 to vector<8x128xf32>
    %17 = arith.addf %16, %15 : vector<8x128xf32>
    %18 = arith.divf %16, %17 : vector<8x128xf32>
    %19 = math.tanh %13 : vector<8x128xf32>
    %20 = vector.extract_strided_slice %18 {offsets = [0, 0], sizes = [8, 32], strides = [1, 1]} : vector<8x128xf32> to vector<8x32xf32>
    %21 = vector.extract_strided_slice %18 {offsets = [0, 32], sizes = [8, 32], strides = [1, 1]} : vector<8x128xf32> to vector<8x32xf32>
    %22 = vector.extract_strided_slice %19 {offsets = [0, 64], sizes = [8, 32], strides = [1, 1]} : vector<8x128xf32> to vector<8x32xf32>
    %23 = vector.extract_strided_slice %18 {offsets = [0, 96], sizes = [8, 32], strides = [1, 1]} : vector<8x128xf32> to vector<8x32xf32>
    %24 = arith.mulf %21, %10 : vector<8x32xf32>
    %25 = arith.mulf %20, %22 : vector<8x32xf32>
    %26 = arith.addf %24, %25 : vector<8x32xf32>
    %27 = math.tanh %26 : vector<8x32xf32>
    %28 = arith.mulf %23, %27 : vector<8x32xf32>
    %29 = tpu.concatenate %28, %10 in 1 : vector<8x32xf32>, vector<8x32xf32> -> vector<8x64xf32>
    %cst_18 = arith.constant dense<0.000000e+00> : vector<8x128xf32>
    %30 = tpu.matmul %29, %8, %cst_18 {dimension_numbers = #tpu.dot_dimension_numbers<[1], [0], [0], [1], [0, 0, 1, 1], [], []>} : vector<8x64xf32>, vector<64x128xf32>, vector<8x128xf32> -> vector<8x128xf32>
    %31 = vector.broadcast %9 : vector<1x128xf32> to vector<8x128xf32>
    %32 = arith.addf %30, %31 : vector<8x128xf32>
    %33 = arith.negf %32 : vector<8x128xf32>
    %34 = math.exp %33 : vector<8x128xf32>
    %cst_19 = arith.constant 1.000000e+00 : f32
    %35 = vector.broadcast %cst_19 : f32 to vector<8x128xf32>
    %36 = arith.addf %35, %34 : vector<8x128xf32>
    %37 = arith.divf %35, %36 : vector<8x128xf32>
    %38 = math.tanh %32 : vector<8x128xf32>
    %39 = vector.extract_strided_slice %37 {offsets = [0, 0], sizes = [8, 32], strides = [1, 1]} : vector<8x128xf32> to vector<8x32xf32>
    %40 = vector.extract_strided_slice %37 {offsets = [0, 32], sizes = [8, 32], strides = [1, 1]} : vector<8x128xf32> to vector<8x32xf32>
    %41 = vector.extract_strided_slice %38 {offsets = [0, 64], sizes = [8, 32], strides = [1, 1]} : vector<8x128xf32> to vector<8x32xf32>
    %42 = vector.extract_strided_slice %37 {offsets = [0, 96], sizes = [8, 32], strides = [1, 1]} : vector<8x128xf32> to vector<8x32xf32>
    %43 = arith.mulf %40, %10 : vector<8x32xf32>
    %44 = arith.mulf %39, %41 : vector<8x32xf32>
    %45 = arith.addf %43, %44 : vector<8x32xf32>
    %46 = math.tanh %45 : vector<8x32xf32>
    %47 = arith.mulf %42, %46 : vector<8x32xf32>
    %c8 = arith.constant 8 : index
    %c0_20 = arith.constant 0 : index
    %48 = vector.load %arg9[%c8, %c0_20] : memref<64x128xf32, #tpu.memory_space<vmem>>, vector<8x128xf32>
    %cst_21 = arith.constant dense<0.000000e+00> : vector<8x128xf32>
    %49 = tpu.matmul %28, %7, %cst_21 {dimension_numbers = #tpu.dot_dimension_numbers<[1], [0], [0], [1], [0, 0, 1, 1], [], []>} : vector<8x32xf32>, vector<32x128xf32>, vector<8x128xf32> -> vector<8x128xf32>
    %50 = arith.addf %48, %49 : vector<8x128xf32>
    %51 = arith.negf %50 : vector<8x128xf32>
    %52 = math.exp %51 : vector<8x128xf32>
    %cst_22 = arith.constant 1.000000e+00 : f32
    %53 = vector.broadcast %cst_22 : f32 to vector<8x128xf32>
    %54 = arith.addf %53, %52 : vector<8x128xf32>
    %55 = arith.divf %53, %54 : vector<8x128xf32>
    %56 = math.tanh %50 : vector<8x128xf32>
    %57 = vector.extract_strided_slice %55 {offsets = [0, 0], sizes = [8, 32], strides = [1, 1]} : vector<8x128xf32> to vector<8x32xf32>
    %58 = vector.extract_strided_slice %55 {offsets = [0, 32], sizes = [8, 32], strides = [1, 1]} : vector<8x128xf32> to vector<8x32xf32>
    %59 = vector.extract_strided_slice %56 {offsets = [0, 64], sizes = [8, 32], strides = [1, 1]} : vector<8x128xf32> to vector<8x32xf32>
    %60 = vector.extract_strided_slice %55 {offsets = [0, 96], sizes = [8, 32], strides = [1, 1]} : vector<8x128xf32> to vector<8x32xf32>
    %61 = arith.mulf %58, %26 : vector<8x32xf32>
    %62 = arith.mulf %57, %59 : vector<8x32xf32>
    %63 = arith.addf %61, %62 : vector<8x32xf32>
    %64 = math.tanh %63 : vector<8x32xf32>
    %65 = arith.mulf %60, %64 : vector<8x32xf32>
    %66 = tpu.concatenate %65, %47 in 1 : vector<8x32xf32>, vector<8x32xf32> -> vector<8x64xf32>
    %cst_23 = arith.constant dense<0.000000e+00> : vector<8x128xf32>
    %67 = tpu.matmul %66, %8, %cst_23 {dimension_numbers = #tpu.dot_dimension_numbers<[1], [0], [0], [1], [0, 0, 1, 1], [], []>} : vector<8x64xf32>, vector<64x128xf32>, vector<8x128xf32> -> vector<8x128xf32>
    %68 = vector.broadcast %9 : vector<1x128xf32> to vector<8x128xf32>
    %69 = arith.addf %67, %68 : vector<8x128xf32>
    %70 = arith.negf %69 : vector<8x128xf32>
    %71 = math.exp %70 : vector<8x128xf32>
    %cst_24 = arith.constant 1.000000e+00 : f32
    %72 = vector.broadcast %cst_24 : f32 to vector<8x128xf32>
    %73 = arith.addf %72, %71 : vector<8x128xf32>
    %74 = arith.divf %72, %73 : vector<8x128xf32>
    %75 = math.tanh %69 : vector<8x128xf32>
    %76 = vector.extract_strided_slice %74 {offsets = [0, 0], sizes = [8, 32], strides = [1, 1]} : vector<8x128xf32> to vector<8x32xf32>
    %77 = vector.extract_strided_slice %74 {offsets = [0, 32], sizes = [8, 32], strides = [1, 1]} : vector<8x128xf32> to vector<8x32xf32>
    %78 = vector.extract_strided_slice %75 {offsets = [0, 64], sizes = [8, 32], strides = [1, 1]} : vector<8x128xf32> to vector<8x32xf32>
    %79 = vector.extract_strided_slice %74 {offsets = [0, 96], sizes = [8, 32], strides = [1, 1]} : vector<8x128xf32> to vector<8x32xf32>
    %80 = arith.mulf %77, %45 : vector<8x32xf32>
    %81 = arith.mulf %76, %78 : vector<8x32xf32>
    %82 = arith.addf %80, %81 : vector<8x32xf32>
    %83 = math.tanh %82 : vector<8x32xf32>
    %84 = arith.mulf %79, %83 : vector<8x32xf32>
    %c16 = arith.constant 16 : index
    %c0_25 = arith.constant 0 : index
    %85 = vector.load %arg9[%c16, %c0_25] : memref<64x128xf32, #tpu.memory_space<vmem>>, vector<8x128xf32>
    %cst_26 = arith.constant dense<0.000000e+00> : vector<8x128xf32>
    %86 = tpu.matmul %65, %7, %cst_26 {dimension_numbers = #tpu.dot_dimension_numbers<[1], [0], [0], [1], [0, 0, 1, 1], [], []>} : vector<8x32xf32>, vector<32x128xf32>, vector<8x128xf32> -> vector<8x128xf32>
    %87 = arith.addf %85, %86 : vector<8x128xf32>
    %88 = arith.negf %87 : vector<8x128xf32>
    %89 = math.exp %88 : vector<8x128xf32>
    %cst_27 = arith.constant 1.000000e+00 : f32
    %90 = vector.broadcast %cst_27 : f32 to vector<8x128xf32>
    %91 = arith.addf %90, %89 : vector<8x128xf32>
    %92 = arith.divf %90, %91 : vector<8x128xf32>
    %93 = math.tanh %87 : vector<8x128xf32>
    %94 = vector.extract_strided_slice %92 {offsets = [0, 0], sizes = [8, 32], strides = [1, 1]} : vector<8x128xf32> to vector<8x32xf32>
    %95 = vector.extract_strided_slice %92 {offsets = [0, 32], sizes = [8, 32], strides = [1, 1]} : vector<8x128xf32> to vector<8x32xf32>
    %96 = vector.extract_strided_slice %93 {offsets = [0, 64], sizes = [8, 32], strides = [1, 1]} : vector<8x128xf32> to vector<8x32xf32>
    %97 = vector.extract_strided_slice %92 {offsets = [0, 96], sizes = [8, 32], strides = [1, 1]} : vector<8x128xf32> to vector<8x32xf32>
    %98 = arith.mulf %95, %63 : vector<8x32xf32>
    %99 = arith.mulf %94, %96 : vector<8x32xf32>
    %100 = arith.addf %98, %99 : vector<8x32xf32>
    %101 = math.tanh %100 : vector<8x32xf32>
    %102 = arith.mulf %97, %101 : vector<8x32xf32>
    %103 = tpu.concatenate %102, %84 in 1 : vector<8x32xf32>, vector<8x32xf32> -> vector<8x64xf32>
    %cst_28 = arith.constant dense<0.000000e+00> : vector<8x128xf32>
    %104 = tpu.matmul %103, %8, %cst_28 {dimension_numbers = #tpu.dot_dimension_numbers<[1], [0], [0], [1], [0, 0, 1, 1], [], []>} : vector<8x64xf32>, vector<64x128xf32>, vector<8x128xf32> -> vector<8x128xf32>
    %105 = vector.broadcast %9 : vector<1x128xf32> to vector<8x128xf32>
    %106 = arith.addf %104, %105 : vector<8x128xf32>
    %107 = arith.negf %106 : vector<8x128xf32>
    %108 = math.exp %107 : vector<8x128xf32>
    %cst_29 = arith.constant 1.000000e+00 : f32
    %109 = vector.broadcast %cst_29 : f32 to vector<8x128xf32>
    %110 = arith.addf %109, %108 : vector<8x128xf32>
    %111 = arith.divf %109, %110 : vector<8x128xf32>
    %112 = math.tanh %106 : vector<8x128xf32>
    %113 = vector.extract_strided_slice %111 {offsets = [0, 0], sizes = [8, 32], strides = [1, 1]} : vector<8x128xf32> to vector<8x32xf32>
    %114 = vector.extract_strided_slice %111 {offsets = [0, 32], sizes = [8, 32], strides = [1, 1]} : vector<8x128xf32> to vector<8x32xf32>
    %115 = vector.extract_strided_slice %112 {offsets = [0, 64], sizes = [8, 32], strides = [1, 1]} : vector<8x128xf32> to vector<8x32xf32>
    %116 = vector.extract_strided_slice %111 {offsets = [0, 96], sizes = [8, 32], strides = [1, 1]} : vector<8x128xf32> to vector<8x32xf32>
    %117 = arith.mulf %114, %82 : vector<8x32xf32>
    %118 = arith.mulf %113, %115 : vector<8x32xf32>
    %119 = arith.addf %117, %118 : vector<8x32xf32>
    %120 = math.tanh %119 : vector<8x32xf32>
    %121 = arith.mulf %116, %120 : vector<8x32xf32>
    %c24 = arith.constant 24 : index
    %c0_30 = arith.constant 0 : index
    %122 = vector.load %arg9[%c24, %c0_30] : memref<64x128xf32, #tpu.memory_space<vmem>>, vector<8x128xf32>
    %cst_31 = arith.constant dense<0.000000e+00> : vector<8x128xf32>
    %123 = tpu.matmul %102, %7, %cst_31 {dimension_numbers = #tpu.dot_dimension_numbers<[1], [0], [0], [1], [0, 0, 1, 1], [], []>} : vector<8x32xf32>, vector<32x128xf32>, vector<8x128xf32> -> vector<8x128xf32>
    %124 = arith.addf %122, %123 : vector<8x128xf32>
    %125 = arith.negf %124 : vector<8x128xf32>
    %126 = math.exp %125 : vector<8x128xf32>
    %cst_32 = arith.constant 1.000000e+00 : f32
    %127 = vector.broadcast %cst_32 : f32 to vector<8x128xf32>
    %128 = arith.addf %127, %126 : vector<8x128xf32>
    %129 = arith.divf %127, %128 : vector<8x128xf32>
    %130 = math.tanh %124 : vector<8x128xf32>
    %131 = vector.extract_strided_slice %129 {offsets = [0, 0], sizes = [8, 32], strides = [1, 1]} : vector<8x128xf32> to vector<8x32xf32>
    %132 = vector.extract_strided_slice %129 {offsets = [0, 32], sizes = [8, 32], strides = [1, 1]} : vector<8x128xf32> to vector<8x32xf32>
    %133 = vector.extract_strided_slice %130 {offsets = [0, 64], sizes = [8, 32], strides = [1, 1]} : vector<8x128xf32> to vector<8x32xf32>
    %134 = vector.extract_strided_slice %129 {offsets = [0, 96], sizes = [8, 32], strides = [1, 1]} : vector<8x128xf32> to vector<8x32xf32>
    %135 = arith.mulf %132, %100 : vector<8x32xf32>
    %136 = arith.mulf %131, %133 : vector<8x32xf32>
    %137 = arith.addf %135, %136 : vector<8x32xf32>
    %138 = math.tanh %137 : vector<8x32xf32>
    %139 = arith.mulf %134, %138 : vector<8x32xf32>
    %140 = tpu.concatenate %139, %121 in 1 : vector<8x32xf32>, vector<8x32xf32> -> vector<8x64xf32>
    %cst_33 = arith.constant dense<0.000000e+00> : vector<8x128xf32>
    %141 = tpu.matmul %140, %8, %cst_33 {dimension_numbers = #tpu.dot_dimension_numbers<[1], [0], [0], [1], [0, 0, 1, 1], [], []>} : vector<8x64xf32>, vector<64x128xf32>, vector<8x128xf32> -> vector<8x128xf32>
    %142 = vector.broadcast %9 : vector<1x128xf32> to vector<8x128xf32>
    %143 = arith.addf %141, %142 : vector<8x128xf32>
    %144 = arith.negf %143 : vector<8x128xf32>
    %145 = math.exp %144 : vector<8x128xf32>
    %cst_34 = arith.constant 1.000000e+00 : f32
    %146 = vector.broadcast %cst_34 : f32 to vector<8x128xf32>
    %147 = arith.addf %146, %145 : vector<8x128xf32>
    %148 = arith.divf %146, %147 : vector<8x128xf32>
    %149 = math.tanh %143 : vector<8x128xf32>
    %150 = vector.extract_strided_slice %148 {offsets = [0, 0], sizes = [8, 32], strides = [1, 1]} : vector<8x128xf32> to vector<8x32xf32>
    %151 = vector.extract_strided_slice %148 {offsets = [0, 32], sizes = [8, 32], strides = [1, 1]} : vector<8x128xf32> to vector<8x32xf32>
    %152 = vector.extract_strided_slice %149 {offsets = [0, 64], sizes = [8, 32], strides = [1, 1]} : vector<8x128xf32> to vector<8x32xf32>
    %153 = vector.extract_strided_slice %148 {offsets = [0, 96], sizes = [8, 32], strides = [1, 1]} : vector<8x128xf32> to vector<8x32xf32>
    %154 = arith.mulf %151, %119 : vector<8x32xf32>
    %155 = arith.mulf %150, %152 : vector<8x32xf32>
    %156 = arith.addf %154, %155 : vector<8x32xf32>
    %157 = math.tanh %156 : vector<8x32xf32>
    %158 = arith.mulf %153, %157 : vector<8x32xf32>
    %c32 = arith.constant 32 : index
    %c0_35 = arith.constant 0 : index
    %159 = vector.load %arg9[%c32, %c0_35] : memref<64x128xf32, #tpu.memory_space<vmem>>, vector<8x128xf32>
    %cst_36 = arith.constant dense<0.000000e+00> : vector<8x128xf32>
    %160 = tpu.matmul %139, %7, %cst_36 {dimension_numbers = #tpu.dot_dimension_numbers<[1], [0], [0], [1], [0, 0, 1, 1], [], []>} : vector<8x32xf32>, vector<32x128xf32>, vector<8x128xf32> -> vector<8x128xf32>
    %161 = arith.addf %159, %160 : vector<8x128xf32>
    %162 = arith.negf %161 : vector<8x128xf32>
    %163 = math.exp %162 : vector<8x128xf32>
    %cst_37 = arith.constant 1.000000e+00 : f32
    %164 = vector.broadcast %cst_37 : f32 to vector<8x128xf32>
    %165 = arith.addf %164, %163 : vector<8x128xf32>
    %166 = arith.divf %164, %165 : vector<8x128xf32>
    %167 = math.tanh %161 : vector<8x128xf32>
    %168 = vector.extract_strided_slice %166 {offsets = [0, 0], sizes = [8, 32], strides = [1, 1]} : vector<8x128xf32> to vector<8x32xf32>
    %169 = vector.extract_strided_slice %166 {offsets = [0, 32], sizes = [8, 32], strides = [1, 1]} : vector<8x128xf32> to vector<8x32xf32>
    %170 = vector.extract_strided_slice %167 {offsets = [0, 64], sizes = [8, 32], strides = [1, 1]} : vector<8x128xf32> to vector<8x32xf32>
    %171 = vector.extract_strided_slice %166 {offsets = [0, 96], sizes = [8, 32], strides = [1, 1]} : vector<8x128xf32> to vector<8x32xf32>
    %172 = arith.mulf %169, %137 : vector<8x32xf32>
    %173 = arith.mulf %168, %170 : vector<8x32xf32>
    %174 = arith.addf %172, %173 : vector<8x32xf32>
    %175 = math.tanh %174 : vector<8x32xf32>
    %176 = arith.mulf %171, %175 : vector<8x32xf32>
    %177 = tpu.concatenate %176, %158 in 1 : vector<8x32xf32>, vector<8x32xf32> -> vector<8x64xf32>
    %cst_38 = arith.constant dense<0.000000e+00> : vector<8x128xf32>
    %178 = tpu.matmul %177, %8, %cst_38 {dimension_numbers = #tpu.dot_dimension_numbers<[1], [0], [0], [1], [0, 0, 1, 1], [], []>} : vector<8x64xf32>, vector<64x128xf32>, vector<8x128xf32> -> vector<8x128xf32>
    %179 = vector.broadcast %9 : vector<1x128xf32> to vector<8x128xf32>
    %180 = arith.addf %178, %179 : vector<8x128xf32>
    %181 = arith.negf %180 : vector<8x128xf32>
    %182 = math.exp %181 : vector<8x128xf32>
    %cst_39 = arith.constant 1.000000e+00 : f32
    %183 = vector.broadcast %cst_39 : f32 to vector<8x128xf32>
    %184 = arith.addf %183, %182 : vector<8x128xf32>
    %185 = arith.divf %183, %184 : vector<8x128xf32>
    %186 = math.tanh %180 : vector<8x128xf32>
    %187 = vector.extract_strided_slice %185 {offsets = [0, 0], sizes = [8, 32], strides = [1, 1]} : vector<8x128xf32> to vector<8x32xf32>
    %188 = vector.extract_strided_slice %185 {offsets = [0, 32], sizes = [8, 32], strides = [1, 1]} : vector<8x128xf32> to vector<8x32xf32>
    %189 = vector.extract_strided_slice %186 {offsets = [0, 64], sizes = [8, 32], strides = [1, 1]} : vector<8x128xf32> to vector<8x32xf32>
    %190 = vector.extract_strided_slice %185 {offsets = [0, 96], sizes = [8, 32], strides = [1, 1]} : vector<8x128xf32> to vector<8x32xf32>
    %191 = arith.mulf %188, %156 : vector<8x32xf32>
    %192 = arith.mulf %187, %189 : vector<8x32xf32>
    %193 = arith.addf %191, %192 : vector<8x32xf32>
    %194 = math.tanh %193 : vector<8x32xf32>
    %195 = arith.mulf %190, %194 : vector<8x32xf32>
    %c40 = arith.constant 40 : index
    %c0_40 = arith.constant 0 : index
    %196 = vector.load %arg9[%c40, %c0_40] : memref<64x128xf32, #tpu.memory_space<vmem>>, vector<8x128xf32>
    %cst_41 = arith.constant dense<0.000000e+00> : vector<8x128xf32>
    %197 = tpu.matmul %176, %7, %cst_41 {dimension_numbers = #tpu.dot_dimension_numbers<[1], [0], [0], [1], [0, 0, 1, 1], [], []>} : vector<8x32xf32>, vector<32x128xf32>, vector<8x128xf32> -> vector<8x128xf32>
    %198 = arith.addf %196, %197 : vector<8x128xf32>
    %199 = arith.negf %198 : vector<8x128xf32>
    %200 = math.exp %199 : vector<8x128xf32>
    %cst_42 = arith.constant 1.000000e+00 : f32
    %201 = vector.broadcast %cst_42 : f32 to vector<8x128xf32>
    %202 = arith.addf %201, %200 : vector<8x128xf32>
    %203 = arith.divf %201, %202 : vector<8x128xf32>
    %204 = math.tanh %198 : vector<8x128xf32>
    %205 = vector.extract_strided_slice %203 {offsets = [0, 0], sizes = [8, 32], strides = [1, 1]} : vector<8x128xf32> to vector<8x32xf32>
    %206 = vector.extract_strided_slice %203 {offsets = [0, 32], sizes = [8, 32], strides = [1, 1]} : vector<8x128xf32> to vector<8x32xf32>
    %207 = vector.extract_strided_slice %204 {offsets = [0, 64], sizes = [8, 32], strides = [1, 1]} : vector<8x128xf32> to vector<8x32xf32>
    %208 = vector.extract_strided_slice %203 {offsets = [0, 96], sizes = [8, 32], strides = [1, 1]} : vector<8x128xf32> to vector<8x32xf32>
    %209 = arith.mulf %206, %174 : vector<8x32xf32>
    %210 = arith.mulf %205, %207 : vector<8x32xf32>
    %211 = arith.addf %209, %210 : vector<8x32xf32>
    %212 = math.tanh %211 : vector<8x32xf32>
    %213 = arith.mulf %208, %212 : vector<8x32xf32>
    %214 = tpu.concatenate %213, %195 in 1 : vector<8x32xf32>, vector<8x32xf32> -> vector<8x64xf32>
    %cst_43 = arith.constant dense<0.000000e+00> : vector<8x128xf32>
    %215 = tpu.matmul %214, %8, %cst_43 {dimension_numbers = #tpu.dot_dimension_numbers<[1], [0], [0], [1], [0, 0, 1, 1], [], []>} : vector<8x64xf32>, vector<64x128xf32>, vector<8x128xf32> -> vector<8x128xf32>
    %216 = vector.broadcast %9 : vector<1x128xf32> to vector<8x128xf32>
    %217 = arith.addf %215, %216 : vector<8x128xf32>
    %218 = arith.negf %217 : vector<8x128xf32>
    %219 = math.exp %218 : vector<8x128xf32>
    %cst_44 = arith.constant 1.000000e+00 : f32
    %220 = vector.broadcast %cst_44 : f32 to vector<8x128xf32>
    %221 = arith.addf %220, %219 : vector<8x128xf32>
    %222 = arith.divf %220, %221 : vector<8x128xf32>
    %223 = math.tanh %217 : vector<8x128xf32>
    %224 = vector.extract_strided_slice %222 {offsets = [0, 0], sizes = [8, 32], strides = [1, 1]} : vector<8x128xf32> to vector<8x32xf32>
    %225 = vector.extract_strided_slice %222 {offsets = [0, 32], sizes = [8, 32], strides = [1, 1]} : vector<8x128xf32> to vector<8x32xf32>
    %226 = vector.extract_strided_slice %223 {offsets = [0, 64], sizes = [8, 32], strides = [1, 1]} : vector<8x128xf32> to vector<8x32xf32>
    %227 = vector.extract_strided_slice %222 {offsets = [0, 96], sizes = [8, 32], strides = [1, 1]} : vector<8x128xf32> to vector<8x32xf32>
    %228 = arith.mulf %225, %193 : vector<8x32xf32>
    %229 = arith.mulf %224, %226 : vector<8x32xf32>
    %230 = arith.addf %228, %229 : vector<8x32xf32>
    %231 = math.tanh %230 : vector<8x32xf32>
    %232 = arith.mulf %227, %231 : vector<8x32xf32>
    %c48 = arith.constant 48 : index
    %c0_45 = arith.constant 0 : index
    %233 = vector.load %arg9[%c48, %c0_45] : memref<64x128xf32, #tpu.memory_space<vmem>>, vector<8x128xf32>
    %cst_46 = arith.constant dense<0.000000e+00> : vector<8x128xf32>
    %234 = tpu.matmul %213, %7, %cst_46 {dimension_numbers = #tpu.dot_dimension_numbers<[1], [0], [0], [1], [0, 0, 1, 1], [], []>} : vector<8x32xf32>, vector<32x128xf32>, vector<8x128xf32> -> vector<8x128xf32>
    %235 = arith.addf %233, %234 : vector<8x128xf32>
    %236 = arith.negf %235 : vector<8x128xf32>
    %237 = math.exp %236 : vector<8x128xf32>
    %cst_47 = arith.constant 1.000000e+00 : f32
    %238 = vector.broadcast %cst_47 : f32 to vector<8x128xf32>
    %239 = arith.addf %238, %237 : vector<8x128xf32>
    %240 = arith.divf %238, %239 : vector<8x128xf32>
    %241 = math.tanh %235 : vector<8x128xf32>
    %242 = vector.extract_strided_slice %240 {offsets = [0, 0], sizes = [8, 32], strides = [1, 1]} : vector<8x128xf32> to vector<8x32xf32>
    %243 = vector.extract_strided_slice %240 {offsets = [0, 32], sizes = [8, 32], strides = [1, 1]} : vector<8x128xf32> to vector<8x32xf32>
    %244 = vector.extract_strided_slice %241 {offsets = [0, 64], sizes = [8, 32], strides = [1, 1]} : vector<8x128xf32> to vector<8x32xf32>
    %245 = vector.extract_strided_slice %240 {offsets = [0, 96], sizes = [8, 32], strides = [1, 1]} : vector<8x128xf32> to vector<8x32xf32>
    %246 = arith.mulf %243, %211 : vector<8x32xf32>
    %247 = arith.mulf %242, %244 : vector<8x32xf32>
    %248 = arith.addf %246, %247 : vector<8x32xf32>
    %249 = math.tanh %248 : vector<8x32xf32>
    %250 = arith.mulf %245, %249 : vector<8x32xf32>
    %251 = tpu.concatenate %250, %232 in 1 : vector<8x32xf32>, vector<8x32xf32> -> vector<8x64xf32>
    %cst_48 = arith.constant dense<0.000000e+00> : vector<8x128xf32>
    %252 = tpu.matmul %251, %8, %cst_48 {dimension_numbers = #tpu.dot_dimension_numbers<[1], [0], [0], [1], [0, 0, 1, 1], [], []>} : vector<8x64xf32>, vector<64x128xf32>, vector<8x128xf32> -> vector<8x128xf32>
    %253 = vector.broadcast %9 : vector<1x128xf32> to vector<8x128xf32>
    %254 = arith.addf %252, %253 : vector<8x128xf32>
    %255 = arith.negf %254 : vector<8x128xf32>
    %256 = math.exp %255 : vector<8x128xf32>
    %cst_49 = arith.constant 1.000000e+00 : f32
    %257 = vector.broadcast %cst_49 : f32 to vector<8x128xf32>
    %258 = arith.addf %257, %256 : vector<8x128xf32>
    %259 = arith.divf %257, %258 : vector<8x128xf32>
    %260 = math.tanh %254 : vector<8x128xf32>
    %261 = vector.extract_strided_slice %259 {offsets = [0, 0], sizes = [8, 32], strides = [1, 1]} : vector<8x128xf32> to vector<8x32xf32>
    %262 = vector.extract_strided_slice %259 {offsets = [0, 32], sizes = [8, 32], strides = [1, 1]} : vector<8x128xf32> to vector<8x32xf32>
    %263 = vector.extract_strided_slice %260 {offsets = [0, 64], sizes = [8, 32], strides = [1, 1]} : vector<8x128xf32> to vector<8x32xf32>
    %264 = vector.extract_strided_slice %259 {offsets = [0, 96], sizes = [8, 32], strides = [1, 1]} : vector<8x128xf32> to vector<8x32xf32>
    %265 = arith.mulf %262, %230 : vector<8x32xf32>
    %266 = arith.mulf %261, %263 : vector<8x32xf32>
    %267 = arith.addf %265, %266 : vector<8x32xf32>
    %268 = math.tanh %267 : vector<8x32xf32>
    %269 = arith.mulf %264, %268 : vector<8x32xf32>
    %c56 = arith.constant 56 : index
    %c0_50 = arith.constant 0 : index
    %270 = vector.load %arg9[%c56, %c0_50] : memref<64x128xf32, #tpu.memory_space<vmem>>, vector<8x128xf32>
    %cst_51 = arith.constant dense<0.000000e+00> : vector<8x128xf32>
    %271 = tpu.matmul %250, %7, %cst_51 {dimension_numbers = #tpu.dot_dimension_numbers<[1], [0], [0], [1], [0, 0, 1, 1], [], []>} : vector<8x32xf32>, vector<32x128xf32>, vector<8x128xf32> -> vector<8x128xf32>
    %272 = arith.addf %270, %271 : vector<8x128xf32>
    %273 = arith.negf %272 : vector<8x128xf32>
    %274 = math.exp %273 : vector<8x128xf32>
    %cst_52 = arith.constant 1.000000e+00 : f32
    %275 = vector.broadcast %cst_52 : f32 to vector<8x128xf32>
    %276 = arith.addf %275, %274 : vector<8x128xf32>
    %277 = arith.divf %275, %276 : vector<8x128xf32>
    %278 = math.tanh %272 : vector<8x128xf32>
    %279 = vector.extract_strided_slice %277 {offsets = [0, 0], sizes = [8, 32], strides = [1, 1]} : vector<8x128xf32> to vector<8x32xf32>
    %280 = vector.extract_strided_slice %277 {offsets = [0, 32], sizes = [8, 32], strides = [1, 1]} : vector<8x128xf32> to vector<8x32xf32>
    %281 = vector.extract_strided_slice %278 {offsets = [0, 64], sizes = [8, 32], strides = [1, 1]} : vector<8x128xf32> to vector<8x32xf32>
    %282 = vector.extract_strided_slice %277 {offsets = [0, 96], sizes = [8, 32], strides = [1, 1]} : vector<8x128xf32> to vector<8x32xf32>
    %283 = arith.mulf %280, %248 : vector<8x32xf32>
    %284 = arith.mulf %279, %281 : vector<8x32xf32>
    %285 = arith.addf %283, %284 : vector<8x32xf32>
    %286 = math.tanh %285 : vector<8x32xf32>
    %287 = arith.mulf %282, %286 : vector<8x32xf32>
    %288 = tpu.concatenate %287, %269 in 1 : vector<8x32xf32>, vector<8x32xf32> -> vector<8x64xf32>
    %cst_53 = arith.constant dense<0.000000e+00> : vector<8x128xf32>
    %289 = tpu.matmul %288, %8, %cst_53 {dimension_numbers = #tpu.dot_dimension_numbers<[1], [0], [0], [1], [0, 0, 1, 1], [], []>} : vector<8x64xf32>, vector<64x128xf32>, vector<8x128xf32> -> vector<8x128xf32>
    %290 = vector.broadcast %9 : vector<1x128xf32> to vector<8x128xf32>
    %291 = arith.addf %289, %290 : vector<8x128xf32>
    %292 = arith.negf %291 : vector<8x128xf32>
    %293 = math.exp %292 : vector<8x128xf32>
    %cst_54 = arith.constant 1.000000e+00 : f32
    %294 = vector.broadcast %cst_54 : f32 to vector<8x128xf32>
    %295 = arith.addf %294, %293 : vector<8x128xf32>
    %296 = arith.divf %294, %295 : vector<8x128xf32>
    %297 = math.tanh %291 : vector<8x128xf32>
    %298 = vector.extract_strided_slice %296 {offsets = [0, 0], sizes = [8, 32], strides = [1, 1]} : vector<8x128xf32> to vector<8x32xf32>
    %299 = vector.extract_strided_slice %296 {offsets = [0, 32], sizes = [8, 32], strides = [1, 1]} : vector<8x128xf32> to vector<8x32xf32>
    %300 = vector.extract_strided_slice %297 {offsets = [0, 64], sizes = [8, 32], strides = [1, 1]} : vector<8x128xf32> to vector<8x32xf32>
    %301 = vector.extract_strided_slice %296 {offsets = [0, 96], sizes = [8, 32], strides = [1, 1]} : vector<8x128xf32> to vector<8x32xf32>
    %302 = arith.mulf %299, %267 : vector<8x32xf32>
    %303 = arith.mulf %298, %300 : vector<8x32xf32>
    %304 = arith.addf %302, %303 : vector<8x32xf32>
    %305 = math.tanh %304 : vector<8x32xf32>
    %306 = arith.mulf %301, %305 : vector<8x32xf32>
    %c0_55 = arith.constant 0 : index
    %c0_56 = arith.constant 0 : index
    %307 = vector.load %arg6[%c0_55, %c0_56] : memref<32x16xf32, #tpu.memory_space<vmem>>, vector<32x16xf32>
    %cst_57 = arith.constant dense<0.000000e+00> : vector<8x16xf32>
    %308 = tpu.matmul %306, %307, %cst_57 {dimension_numbers = #tpu.dot_dimension_numbers<[1], [0], [0], [1], [0, 0, 1, 1], [], []>} : vector<8x32xf32>, vector<32x16xf32>, vector<8x16xf32> -> vector<8x16xf32>
    %c0_58 = arith.constant 0 : index
    %c0_59 = arith.constant 0 : index
    %309 = vector.load %arg7[%c0_58, %c0_59] : memref<1x16xf32, #tpu.memory_space<vmem>>, vector<1x16xf32>
    %310 = vector.broadcast %309 : vector<1x16xf32> to vector<8x16xf32>
    %311 = arith.addf %308, %310 : vector<8x16xf32>
    %c0_60 = arith.constant 0 : index
    %c0_61 = arith.constant 0 : index
    %312 = vector.load %arg8[%c0_60, %c0_61] : memref<8x16xf32, #tpu.memory_space<vmem>>, vector<8x16xf32>
    tpu.vector_store %arg8[%c0_60, %c0_61], %311 {strides = array<i32>} : memref<8x16xf32, #tpu.memory_space<vmem>>, vector<8x16xf32>,
    return
  }
}

</mosaic_0001>

<bundles_post_ra>
// kernel: _lstm_model_forward.1
= control target key start
LH: loop header
LB: loop body
LE: loop exit
PB: predicated region body
PF: predicated region fallthrough
CT: control target
= control target key end

     0   :  { %vm46_vm0 = vcmask 130048   ;;  %v2649_v0 = vmov 0.0|0.0   ;;  %vm2650_vm1 = vmmov 0   ;;  %v2651_v4 = vmov 0.0   ;;  %s2652_s21 = smov 64   ;;  %s3116_s1 = inlined_call_operand.vmem [shape: f32[16,128], index: 1, kind: input, shape index: {}]   ;;  %s3117_s3 = inlined_call_operand.vmem [shape: f32[32,128], index: 3, kind: input, shape index: {}]   ;;  %s3118_s0 = inlined_call_operand.vmem [shape: f32[64,16], index: 0, kind: input, shape index: {}]   ;;  %s3119_s2 = inlined_call_operand.vmem [shape: f32[1,128], index: 2, kind: input, shape index: {}]   ;;  %s3120_s4 = inlined_call_operand.vmem [shape: f32[64,128], index: 4, kind: input, shape index: {}]   ;;  %s3121_s5 = inlined_call_operand.vmem [shape: f32[1,128], index: 5, kind: input, shape index: {}]   ;;  %s3122_s6 = inlined_call_operand.vmem [shape: f32[32,16], index: 6, kind: input, shape index: {}]   ;;  %s3123_s7 = inlined_call_operand.vmem [shape: f32[1,16], index: 7, kind: input, shape index: {}]   ;;  %s3124_s8 = inlined_call_operand.vmem [shape: f32[8,16], index: 8, kind: output, shape index: {}]  }
   0x1   :  { %2366 = vmatprep.subr.bf16.mxu1 %v2649_v0  ;;  %v37_v1 = vld [vmem:[%s3116_s1] sm:$0xff]  ;;  %v38_v2 = vld [vmem:[%s3116_s1 + $0x8] sm:$0xff]  ;;  %2119 = vmatprep.mubr.msk.f32.mxu1 %vm2650_vm1, %v2651_v4  ;;  %v186_v9 = vld [vmem:[%s3117_s3 + $0x10] sm:$0xff]  ;;  %vm198_vm2 = vcmask 261120   ;;  %vm308_vm3 = vcmask 523264  }
   0x2   :  { %v184_v3 = vld [vmem:[%s3117_s3] sm:$0xff]  ;;  %v2362_v5 = vpack.c.bf16 %v38_v2, %v37_v1  ;;  %v185_v6 = vld [vmem:[%s3117_s3 + $0x8] sm:$0xff]  ;;  %v187_v10 = vld [vmem:[%s3117_s3 + $0x18] sm:$0xff] }
   0x3   :  { %v29_v7 = vld [vmem:[%s3118_s0] sm:$0xff]  ;;  %v2717_v8 = vpack.c.bf16 %v185_v6, %v184_v3  ;;  %v30_v11 = vld [vmem:[%s3118_s0 + $0x8] sm:$0xff]  ;;  %v2730_v12 = vpack.c.bf16 %v187_v10, %v186_v9  ;;  %v31_v30 = vld [vmem:[%s3118_s0 + $0x10] sm:$0xff] }
   0x4   :  { %2099 = vmatprep.mubr.msk.f32.mxu0 %vm46_vm0, %v29_v7  ;;  %2363 = vmatprep.subr.bf16.mxu0 %v2362_v5  ;;  %v2747_v13 = vld [vmem:[%s3119_s2] ss:$0 sm:$0xff]  ;;  %s2653_s2 = smov 32   ;;  %v32_v31 = vld [vmem:[%s3118_s0 + $0x18] sm:$0xff]  ;;  %v189_v34 = vld [vmem:[%s3120_s4 + $0x8] sm:$0xff] }
   0x5   :  { %2368 = vmatpush3.bf16.msra.mxu1 %v2717_v8  ;;  %2365 = vmatpush3.bf16.msra.mxu0 %v2362_v5  ;;  %v33_v32 = vld [vmem:[%s3118_s0 + $0x20] sm:$0xff]  ;;  %v190_v35 = vld [vmem:[%s3120_s4 + $0x10] sm:$0xff]  ;;  %v191_v37 = vld [vmem:[%s3120_s4 + $0x18] sm:$0xff] }
   0x6   :  { %2369 = vmatprep.subr.bf16.mxu1 %v2649_v0  ;;  %2372 = vmatprep.subr.bf16.mxu0 %v2649_v0  ;;  %v188_v33 = vld [vmem:[%s3120_s4] sm:$0xff]  ;;  %v34_v38 = vld [vmem:[%s3118_s0 + $0x28] sm:$0xff]  ;;  %v2787_v39 = vpack.c.bf16 %v191_v37, %v190_v35  ;;  %v35_v40 = vld [vmem:[%s3118_s0 + $0x30] sm:$0xff] }
   0x7   :  { %v2776_v36 = vpack.c.bf16 %v189_v34, %v188_v33  ;;  %v192_v41 = vld [vmem:[%s3120_s4 + $0x20] sm:$0xff]  ;;  %v193_v42 = vld [vmem:[%s3120_s4 + $0x28] sm:$0xff]  ;;  %v36_v43 = vld [vmem:[%s3118_s0 + $0x38] sm:$0xff] }
   0x8   :  { %2100 = vmatmul.mubr.msk.f32.vlgmr.msra.gmra.mrb[0].mxu0 %vm46_vm0, %v30_v11  ;;  %v2805_v44 = vpack.c.bf16 %v193_v42, %v192_v41  ;;  %v194_v45 = vld [vmem:[%s3120_s4 + $0x30] sm:$0xff]  ;;  %v195_v46 = vld [vmem:[%s3120_s4 + $0x38] sm:$0xff]  ;;  %v2861_v60 = vld [vmem:[%s3121_s5] ss:$0 sm:$0xff] }
   0x9   :  { %2371 = vmatpush3.bf16.msra.mxu1 %v2730_v12  ;;  %2102 = vmatprep.mubr.msk.f32.mxu0 %vm46_vm0, %v31_v30  ;;  %v2819_v48 = vpack.c.bf16 %v195_v46, %v194_v45 }
   0xa   :  { %2384 = vmatprep.subr.bf16.mxu1 %v2649_v0  ;;  %2374 = vmatpush3.bf16.msra.mxu0 %v2776_v36 }
   0xb   :  { %2375 = vmatprep.subr.bf16.mxu0 %v2649_v0 }
   0xc   :  { %2120 = vmatmul.mubr.f32.vlgmr.msra.gmra.mrb[0].mxu1 %v2651_v4  ;;  %2103 = vmatmul.mubr.msk.f32.gmra.mrb[2].mxu0 %vm46_vm0, %v32_v31 }
   0xd   :  { %2386 = vmatpush3.bf16.msra.mxu1 %v2717_v8  ;;  %2149 = vmatprep.mubr.msk.f32.mxu1 %vm2650_vm1, %v2651_v4 }
   0xe   :  { %2387 = vmatprep.subr.bf16.mxu1 %v2649_v0  ;;  %2105 = vmatprep.mubr.msk.f32.mxu0 %vm46_vm0, %v33_v32 }
   0xf   :  { %2377 = vmatpush3.bf16.msra.mxu0 %v2787_v39 }
  0x10   :  { %2106 = vmatmul.mubr.msk.f32.gmra.mrb[4].mxu0 %vm46_vm0, %v34_v38  ;;  %2378 = vmatprep.subr.bf16.mxu0 %v2649_v0 }
  0x11   :  { %2389 = vmatpush3.bf16.msra.mxu1 %v2730_v12  ;;  %2108 = vmatprep.mubr.msk.f32.mxu0 %vm46_vm0, %v35_v40 }
  0x12   :  { %2390 = vmatprep.subr.bf16.mxu1 %v2649_v0 }
  0x13   :  { %2380 = vmatpush3.bf16.msra.mxu0 %v2805_v44 }
  0x14   :  { %2109 = vmatmul.mubr.msk.f32.gmra.mrb[6].mxu0 %vm46_vm0, %v36_v43  ;;  %2381 = vmatprep.subr.bf16.mxu0 %v2649_v0 }
  0x15   :  { %2138 = vmatprep.mubr.msk.f32.mxu0 %vm2650_vm1, %v2651_v4 }
  0x17   :  { %2383 = vmatpush3.bf16.msra.mxu0 %v2819_v48 }
  0x18   :  { %2402 = vmatprep.subr.bf16.mxu0 %v2649_v0 }
  0xdb   :  { %v2749_v14 = vpop.f32.mrb[0].mxu0 }
  0xdc   :  { %v137_v15 = vpop.f32.mrb[1].mxu0  ;;  %v143_v59 = vadd.f32 %v2749_v14, %v2747_v13 }
  0xdd   :  { %v138_v16 = vadd.f32 %v2747_v13, %v137_v15 }
  0xdf   :  { %v268_v17 = vpop.f32.mrb[0].mxu1  ;;  %v2825_v51 = vpop.f32.mrb[2].mxu0 }
  0xe0   :  { %v272_v18 = vadd.f32 %v268_v17, %v138_v16  ;;  %v2121_v19 = vpop.f32.mrb[1].mxu1  ;;  %v2827_v52 = vpop.f32.mrb[3].mxu0 }
  0xe1   :  { %v148_v38 = vadd.f32 %v2747_v13, %v2827_v52 }
  0xe2   :  { %2521 = vtanh.f32 %v272_v18  ;;  %v1934_v21 = vmul.f32 -1.442695, %v272_v18 }
  0xe3   :  { %v2829_v53 = vpop.f32.mrb[4].mxu0 }
  0xe4   :  { %2523 = vpow2.f32 %v1934_v21  ;;  %v2831_v54 = vpop.f32.mrb[5].mxu0 }
  0xe7   :  { %v2833_v55 = vpop.f32.mrb[6].mxu0 }
  0xe8   :  { %v2835_v56 = vpop.f32.mrb[7].mxu0 }
  0xec   :  { %v2522_v20 = vpop.eup %2521 }
  0xed   :  { %282 = vrot.lane.b32.xlu0 %v2522_v20, %s2652_s21 }
  0xee   :  { %v2524_v22 = vpop.eup %2523 }
  0xef   :  { %v276_v23 = vadd.f32 1.0, %v2524_v22 }
  0xf1   :  { %2525 = vrcp.f32 %v276_v23 }
  0xfb   :  { %v2526_v24 = vpop.eup %2525 }
  0xfc   :  { %v280_v27 = vmul.f32 0.0, %v2526_v24 }
 0x15f   :  { %v283_v25 = vpop.permute.xlu0 %282 }
 0x160   :  { %v285_v26 = vmul.f32 %v2526_v24, %v283_v25 }
 0x162   :  { %287 = vrot.lane.b32.xlu0 %v285_v26, %s2653_s2 }
 0x1d4   :  { %v288_v28 = vpop.permute.xlu0 %287 }
 0x1d5   :  { %v2754_v29 = vadd.f32 %v288_v28, %v280_v27 }
 0x1d7   :  { %2527 = vtanh.f32 %v2754_v29 }
 0x1e1   :  { %v2528_v47 = vpop.eup %2527 }
 0x1e2   :  { %293 = vrot.lane.b32.xlu1 %v2528_v47, %s2652_s21 }
 0x254   :  { %v294_v49 = vpop.permute.xlu1 %293 }
 0x255   :  { %v296_v50 = vmul.f32 %v2526_v24, %v294_v49 }
 0x257   :  { %298 = vrot.lane.b32.xlu1 %v296_v50, %s2653_s2 }
 0x2c9   :  { %v299_v57 = vpop.permute.xlu1 %298 }
 0x2ca   :  { %v301_v58 = vsel %vm198_vm2, %v299_v57, 0.0  ;;  %2150 = vmatmul.mubr.msk.f32.vlgmr.msra.gmra.mrb[2].mxu1 %vm198_vm2, %v299_v57 }
 0x2cb   :  { %2139 = vmatmul.mubr.msk.f32.vlgmr.msra.gmra.mrb[8].mxu0 %vm308_vm3, %v301_v58  ;;  %2392 = vmatpush3.bf16.msra.mxu1 %v2776_v36 }
 0x2cc   :  { %2393 = vmatprep.subr.bf16.mxu1 %v2649_v0  ;;  %2404 = vmatpush3.bf16.msra.mxu0 %v2717_v8 }
 0x2cd   :  { %2405 = vmatprep.subr.bf16.mxu0 %v2649_v0  ;;  %2179 = vmatprep.mubr.msk.f32.mxu0 %vm2650_vm1, %v2651_v4 }
 0x2ce   :  { %2168 = vmatprep.mubr.msk.f32.mxu1 %vm2650_vm1, %v2651_v4 }
 0x2cf   :  { %2395 = vmatpush3.bf16.msra.mxu1 %v2787_v39 }
 0x2d0   :  { %2396 = vmatprep.subr.bf16.mxu1 %v2649_v0  ;;  %2407 = vmatpush3.bf16.msra.mxu0 %v2730_v12 }
 0x2d1   :  { %2408 = vmatprep.subr.bf16.mxu0 %v2649_v0 }
 0x2d3   :  { %2398 = vmatpush3.bf16.msra.mxu1 %v2805_v44 }
 0x2d4   :  { %2399 = vmatprep.subr.bf16.mxu1 %v2649_v0 }
 0x2d7   :  { %2401 = vmatpush3.bf16.msra.mxu1 %v2819_v48 }
 0x2d8   :  { %2420 = vmatprep.subr.bf16.mxu1 %v2649_v0 }
 0x39d   :  { %v475_v61 = vpop.f32.mrb[2].mxu1 }
 0x39e   :  { %v479_v62 = vadd.f32 %v475_v61, %v143_v59  ;;  %v378_v63 = vpop.f32.mrb[8].mxu0  ;;  %v2151_v1 = vpop.f32.mrb[3].mxu1 }
 0x39f   :  { %v379_v2 = vadd.f32 %v2861_v60, %v378_v63  ;;  %v2140_v3 = vpop.f32.mrb[9].mxu0 }
 0x3a0   :  { %2529 = vtanh.f32 %v479_v62  ;;  %v1939_v7 = vmul.f32 -1.442695, %v479_v62 }
 0x3a1   :  { %2531 = vtanh.f32 %v379_v2  ;;  %v1937_v9 = vmul.f32 -1.442695, %v379_v2 }
 0x3a2   :  { %2533 = vpow2.f32 %v1939_v7 }
 0x3a3   :  { %2535 = vpow2.f32 %v1937_v9 }
 0x3aa   :  { %v2530_v5 = vpop.eup %2529 }
 0x3ab   :  { %v2532_v6 = vpop.eup %2531  ;;  %489 = vrot.lane.b32.xlu1 %v2530_v5, %s2652_s21 }
 0x3ac   :  { %391 = vrot.lane.b32.xlu0 %v2532_v6, %s2652_s21  ;;  %v2534_v10 = vpop.eup %2533 }
 0x3ad   :  { %v2536_v11 = vpop.eup %2535  ;;  %v483_v14 = vadd.f32 1.0, %v2534_v10 }
 0x3ae   :  { %v385_v15 = vadd.f32 1.0, %v2536_v11 }
 0x3af   :  { %2537 = vrcp.f32 %v483_v14 }
 0x3b0   :  { %2539 = vrcp.f32 %v385_v15 }
 0x3b9   :  { %v2538_v16 = vpop.eup %2537 }
 0x3ba   :  { %v2540_v18 = vpop.eup %2539  ;;  %v487_v22 = vmul.f32 %v2538_v16, %v2754_v29 }
 0x3bb   :  { %v389_v24 = vmul.f32 0.0, %v2540_v18 }
 0x41d   :  { %v490_v17 = vpop.permute.xlu1 %489 }
 0x41e   :  { %v492_v19 = vmul.f32 %v2538_v16, %v490_v17  ;;  %v392_v20 = vpop.permute.xlu0 %391 }
 0x41f   :  { %v394_v21 = vmul.f32 %v2540_v18, %v392_v20 }
 0x420   :  { %494 = vrot.lane.b32.xlu1 %v492_v19, %s2653_s2 }
 0x421   :  { %396 = vrot.lane.b32.xlu0 %v394_v21, %s2653_s2 }
 0x492   :  { %v495_v23 = vpop.permute.xlu1 %494 }
 0x493   :  { %v2869_v25 = vadd.f32 %v495_v23, %v487_v22  ;;  %v397_v26 = vpop.permute.xlu0 %396 }
 0x494   :  { %v2871_v27 = vadd.f32 %v397_v26, %v389_v24  ;;  %v153_v24 = vadd.f32 %v2825_v51, %v2747_v13 }
 0x495   :  { %2541 = vtanh.f32 %v2869_v25 }
 0x496   :  { %2543 = vtanh.f32 %v2871_v27 }
 0x49f   :  { %v2542_v28 = vpop.eup %2541 }
 0x4a0   :  { %v2544_v30 = vpop.eup %2543  ;;  %500 = vrot.lane.b32.xlu1 %v2542_v28, %s2652_s21 }
 0x4a1   :  { %402 = vrot.lane.b32.xlu0 %v2544_v30, %s2652_s21 }
 0x512   :  { %v501_v31 = vpop.permute.xlu1 %500 }
 0x513   :  { %v503_v32 = vmul.f32 %v2538_v16, %v501_v31  ;;  %v403_v29 = vpop.permute.xlu0 %402 }
 0x514   :  { %v405_v33 = vmul.f32 %v2540_v18, %v403_v29 }
 0x515   :  { %505 = vrot.lane.b32.xlu0 %v503_v32, %s2653_s2 }
 0x516   :  { %509 = vrot.lane.b32.xlu1 %v405_v33, %s2652_s21 }
 0x587   :  { %v506_v34 = vpop.permute.xlu0 %505 }
 0x588   :  { %v510_v35 = vpop.permute.xlu1 %509  ;;  %2180 = vmatmul.mubr.msk.f32.vlgmr.msra.gmra.mrb[10].mxu0 %vm198_vm2, %v506_v34 }
 0x589   :  { %v512_v37 = vsel %vm198_vm2, %v506_v34, %v510_v35  ;;  %2410 = vmatpush3.bf16.msra.mxu0 %v2776_v36  ;;  %2198 = vmatprep.mubr.msk.f32.mxu0 %vm2650_vm1, %v2651_v4 }
 0x58a   :  { %2169 = vmatmul.mubr.msk.f32.vlgmr.msra.gmra.mrb[4].mxu1 %vm308_vm3, %v512_v37  ;;  %2411 = vmatprep.subr.bf16.mxu0 %v2649_v0 }
 0x58b   :  { %2422 = vmatpush3.bf16.msra.mxu1 %v2717_v8  ;;  %2209 = vmatprep.mubr.msk.f32.mxu1 %vm2650_vm1, %v2651_v4 }
 0x58c   :  { %2423 = vmatprep.subr.bf16.mxu1 %v2649_v0 }
 0x58d   :  { %2413 = vmatpush3.bf16.msra.mxu0 %v2787_v39 }
 0x58e   :  { %2414 = vmatprep.subr.bf16.mxu0 %v2649_v0 }
 0x58f   :  { %2425 = vmatpush3.bf16.msra.mxu1 %v2730_v12 }
 0x590   :  { %2426 = vmatprep.subr.bf16.mxu1 %v2649_v0 }
 0x591   :  { %2416 = vmatpush3.bf16.msra.mxu0 %v2805_v44 }
 0x592   :  { %2417 = vmatprep.subr.bf16.mxu0 %v2649_v0 }
 0x595   :  { %2419 = vmatpush3.bf16.msra.mxu0 %v2819_v48 }
 0x596   :  { %2438 = vmatprep.subr.bf16.mxu0 %v2649_v0 }
 0x65b   :  { %v679_v40 = vpop.f32.mrb[10].mxu0 }
 0x65c   :  { %v683_v41 = vadd.f32 %v679_v40, %v148_v38  ;;  %v2181_v42 = vpop.f32.mrb[11].mxu0 }
 0x65d   :  { %v582_v43 = vpop.f32.mrb[4].mxu1 }
 0x65e   :  { %2545 = vtanh.f32 %v683_v41  ;;  %v583_v45 = vadd.f32 %v2861_v60, %v582_v43  ;;  %v2170_v46 = vpop.f32.mrb[5].mxu1  ;;  %v1943_v50 = vmul.f32 -1.442695, %v683_v41 }
 0x660   :  { %2547 = vtanh.f32 %v583_v45  ;;  %v1941_v57 = vmul.f32 -1.442695, %v583_v45 }
 0x661   :  { %2549 = vpow2.f32 %v1943_v50 }
 0x662   :  { %2551 = vpow2.f32 %v1941_v57 }
 0x668   :  { %v2546_v47 = vpop.eup %2545 }
 0x669   :  { %693 = vrot.lane.b32.xlu1 %v2546_v47, %s2652_s21 }
 0x66a   :  { %v2548_v49 = vpop.eup %2547 }
 0x66b   :  { %595 = vrot.lane.b32.xlu0 %v2548_v49, %s2652_s21  ;;  %v2550_v52 = vpop.eup %2549 }
 0x66c   :  { %v2552_v58 = vpop.eup %2551  ;;  %v687_v59 = vadd.f32 1.0, %v2550_v52 }
 0x66d   :  { %v589_v61 = vadd.f32 1.0, %v2552_v58 }
 0x66e   :  { %2553 = vrcp.f32 %v687_v59 }
 0x66f   :  { %2555 = vrcp.f32 %v589_v61 }
 0x678   :  { %v2554_v62 = vpop.eup %2553 }
 0x679   :  { %v2556_v2 = vpop.eup %2555  ;;  %v691_v6 = vmul.f32 %v2554_v62, %v2869_v25 }
 0x67a   :  { %v593_v10 = vmul.f32 %v2556_v2, %v2871_v27 }
 0x6db   :  { %v694_v63 = vpop.permute.xlu1 %693 }
 0x6dc   :  { %v696_v1 = vmul.f32 %v2554_v62, %v694_v63 }
 0x6dd   :  { %v596_v3 = vpop.permute.xlu0 %595 }
 0x6de   :  { %698 = vrot.lane.b32.xlu1 %v696_v1, %s2653_s2  ;;  %v598_v5 = vmul.f32 %v2556_v2, %v596_v3 }
 0x6e0   :  { %600 = vrot.lane.b32.xlu0 %v598_v5, %s2653_s2 }
 0x750   :  { %v699_v7 = vpop.permute.xlu1 %698 }
 0x751   :  { %v2906_v9 = vadd.f32 %v699_v7, %v691_v6  ;;  %v158_v7 = vadd.f32 %v2747_v13, %v2831_v54 }
 0x752   :  { %v601_v11 = vpop.permute.xlu0 %600 }
 0x753   :  { %2557 = vtanh.f32 %v2906_v9  ;;  %v2910_v14 = vadd.f32 %v601_v11, %v593_v10 }
 0x755   :  { %2559 = vtanh.f32 %v2910_v14 }
 0x75d   :  { %v2558_v15 = vpop.eup %2557 }
 0x75e   :  { %704 = vrot.lane.b32.xlu1 %v2558_v15, %s2652_s21 }
 0x75f   :  { %v2560_v16 = vpop.eup %2559 }
 0x760   :  { %606 = vrot.lane.b32.xlu0 %v2560_v16, %s2652_s21 }
 0x7d0   :  { %v705_v17 = vpop.permute.xlu1 %704 }
 0x7d1   :  { %v707_v18 = vmul.f32 %v2554_v62, %v705_v17 }
 0x7d2   :  { %v607_v19 = vpop.permute.xlu0 %606 }
 0x7d3   :  { %709 = vrot.lane.b32.xlu0 %v707_v18, %s2653_s2  ;;  %v609_v20 = vmul.f32 %v2556_v2, %v607_v19 }
 0x7d5   :  { %713 = vrot.lane.b32.xlu1 %v609_v20, %s2652_s21 }
 0x845   :  { %v710_v21 = vpop.permute.xlu0 %709 }
 0x846   :  { %2210 = vmatmul.mubr.msk.f32.vlgmr.msra.gmra.mrb[6].mxu1 %vm198_vm2, %v710_v21 }
 0x847   :  { %2428 = vmatpush3.bf16.msra.mxu1 %v2776_v36  ;;  %2228 = vmatprep.mubr.msk.f32.mxu1 %vm2650_vm1, %v2651_v4  ;;  %v714_v22 = vpop.permute.xlu1 %713 }
 0x848   :  { %2429 = vmatprep.subr.bf16.mxu1 %v2649_v0  ;;  %v716_v23 = vsel %vm198_vm2, %v710_v21, %v714_v22 }
 0x849   :  { %2199 = vmatmul.mubr.msk.f32.vlgmr.msra.gmra.mrb[12].mxu0 %vm308_vm3, %v716_v23 }
 0x84a   :  { %2440 = vmatpush3.bf16.msra.mxu0 %v2717_v8  ;;  %2239 = vmatprep.mubr.msk.f32.mxu0 %vm2650_vm1, %v2651_v4 }
 0x84b   :  { %2431 = vmatpush3.bf16.msra.mxu1 %v2787_v39  ;;  %2441 = vmatprep.subr.bf16.mxu0 %v2649_v0 }
 0x84c   :  { %2432 = vmatprep.subr.bf16.mxu1 %v2649_v0 }
 0x84e   :  { %2443 = vmatpush3.bf16.msra.mxu0 %v2730_v12 }
 0x84f   :  { %2434 = vmatpush3.bf16.msra.mxu1 %v2805_v44  ;;  %2444 = vmatprep.subr.bf16.mxu0 %v2649_v0 }
 0x850   :  { %2435 = vmatprep.subr.bf16.mxu1 %v2649_v0 }
 0x853   :  { %2437 = vmatpush3.bf16.msra.mxu1 %v2819_v48 }
 0x854   :  { %2456 = vmatprep.subr.bf16.mxu1 %v2649_v0 }
 0x919   :  { %v883_v25 = vpop.f32.mrb[6].mxu1 }
 0x91a   :  { %v887_v26 = vadd.f32 %v883_v25, %v153_v24  ;;  %v2211_v27 = vpop.f32.mrb[7].mxu1 }
 0x91c   :  { %2561 = vtanh.f32 %v887_v26  ;;  %v786_v28 = vpop.f32.mrb[12].mxu0  ;;  %v1947_v33 = vmul.f32 -1.442695, %v887_v26 }
 0x91d   :  { %v787_v30 = vadd.f32 %v2861_v60, %v786_v28  ;;  %v2200_v31 = vpop.f32.mrb[13].mxu0 }
 0x91f   :  { %2563 = vtanh.f32 %v787_v30  ;;  %v1945_v34 = vmul.f32 -1.442695, %v787_v30 }
 0x920   :  { %2565 = vpow2.f32 %v1947_v33 }
 0x921   :  { %2567 = vpow2.f32 %v1945_v34 }
 0x926   :  { %v2562_v32 = vpop.eup %2561 }
 0x927   :  { %897 = vrot.lane.b32.xlu1 %v2562_v32, %s2652_s21 }
 0x929   :  { %v2564_v29 = vpop.eup %2563 }
 0x92a   :  { %799 = vrot.lane.b32.xlu0 %v2564_v29, %s2652_s21  ;;  %v2566_v51 = vpop.eup %2565 }
 0x92b   :  { %v891_v35 = vadd.f32 1.0, %v2566_v51  ;;  %v2568_v37 = vpop.eup %2567 }
 0x92c   :  { %v793_v38 = vadd.f32 1.0, %v2568_v37 }
 0x92d   :  { %2569 = vrcp.f32 %v891_v35 }
 0x92e   :  { %2571 = vrcp.f32 %v793_v38 }
 0x937   :  { %v2570_v40 = vpop.eup %2569 }
 0x938   :  { %v2572_v43 = vpop.eup %2571  ;;  %v895_v47 = vmul.f32 %v2570_v40, %v2906_v9 }
 0x939   :  { %v797_v57 = vmul.f32 %v2572_v43, %v2910_v14 }
 0x999   :  { %v898_v41 = vpop.permute.xlu1 %897 }
 0x99a   :  { %v900_v42 = vmul.f32 %v2570_v40, %v898_v41 }
 0x99c   :  { %902 = vrot.lane.b32.xlu1 %v900_v42, %s2653_s2  ;;  %v800_v45 = vpop.permute.xlu0 %799 }
 0x99d   :  { %v802_v46 = vmul.f32 %v2572_v43, %v800_v45 }
 0x99f   :  { %804 = vrot.lane.b32.xlu0 %v802_v46, %s2653_s2 }
 0xa0e   :  { %v903_v49 = vpop.permute.xlu1 %902 }
 0xa0f   :  { %v2944_v50 = vadd.f32 %v903_v49, %v895_v47  ;;  %v163_v47 = vadd.f32 %v2829_v53, %v2747_v13 }
 0xa11   :  { %2573 = vtanh.f32 %v2944_v50  ;;  %v805_v52 = vpop.permute.xlu0 %804 }
 0xa12   :  { %v2948_v58 = vadd.f32 %v805_v52, %v797_v57 }
 0xa14   :  { %2575 = vtanh.f32 %v2948_v58 }
 0xa1b   :  { %v2574_v59 = vpop.eup %2573 }
 0xa1c   :  { %908 = vrot.lane.b32.xlu1 %v2574_v59, %s2652_s21 }
 0xa1e   :  { %v2576_v61 = vpop.eup %2575 }
 0xa1f   :  { %810 = vrot.lane.b32.xlu0 %v2576_v61, %s2652_s21 }
 0xa8e   :  { %v909_v62 = vpop.permute.xlu1 %908 }
 0xa8f   :  { %v911_v63 = vmul.f32 %v2570_v40, %v909_v62 }
 0xa91   :  { %913 = vrot.lane.b32.xlu0 %v911_v63, %s2653_s2  ;;  %v811_v1 = vpop.permute.xlu0 %810 }
 0xa92   :  { %v813_v2 = vmul.f32 %v2572_v43, %v811_v1 }
 0xa94   :  { %917 = vrot.lane.b32.xlu1 %v813_v2, %s2652_s21 }
 0xb03   :  { %v914_v3 = vpop.permute.xlu0 %913 }
 0xb04   :  { %2240 = vmatmul.mubr.msk.f32.vlgmr.msra.gmra.mrb[14].mxu0 %vm198_vm2, %v914_v3 }
 0xb05   :  { %2446 = vmatpush3.bf16.msra.mxu0 %v2776_v36  ;;  %2258 = vmatprep.mubr.msk.f32.mxu0 %vm2650_vm1, %v2651_v4 }
 0xb06   :  { %2447 = vmatprep.subr.bf16.mxu0 %v2649_v0  ;;  %v918_v5 = vpop.permute.xlu1 %917 }
 0xb07   :  { %v920_v6 = vsel %vm198_vm2, %v914_v3, %v918_v5 }
 0xb08   :  { %2229 = vmatmul.mubr.msk.f32.vlgmr.msra.gmra.mrb[8].mxu1 %vm308_vm3, %v920_v6 }
 0xb09   :  { %2449 = vmatpush3.bf16.msra.mxu0 %v2787_v39  ;;  %2458 = vmatpush3.bf16.msra.mxu1 %v2717_v8 }
 0xb0a   :  { %2450 = vmatprep.subr.bf16.mxu0 %v2649_v0  ;;  %2459 = vmatprep.subr.bf16.mxu1 %v2649_v0 }
 0xb0b   :  { %2269 = vmatprep.mubr.msk.f32.mxu1 %vm2650_vm1, %v2651_v4 }
 0xb0d   :  { %2452 = vmatpush3.bf16.msra.mxu0 %v2805_v44  ;;  %2461 = vmatpush3.bf16.msra.mxu1 %v2730_v12 }
 0xb0e   :  { %2453 = vmatprep.subr.bf16.mxu0 %v2649_v0  ;;  %2462 = vmatprep.subr.bf16.mxu1 %v2649_v0 }
 0xb11   :  { %2455 = vmatpush3.bf16.msra.mxu0 %v2819_v48 }
 0xb12   :  { %2474 = vmatprep.subr.bf16.mxu0 %v2649_v0 }
 0xbd7   :  { %v1087_v9 = vpop.f32.mrb[14].mxu0 }
 0xbd8   :  { %v1091_v10 = vadd.f32 %v1087_v9, %v158_v7  ;;  %v2241_v11 = vpop.f32.mrb[15].mxu0 }
 0xbda   :  { %2577 = vtanh.f32 %v1091_v10  ;;  %v1951_v19 = vmul.f32 -1.442695, %v1091_v10 }
 0xbdb   :  { %v990_v14 = vpop.f32.mrb[8].mxu1 }
 0xbdc   :  { %v991_v15 = vadd.f32 %v2861_v60, %v990_v14  ;;  %v2230_v16 = vpop.f32.mrb[9].mxu1 }
 0xbde   :  { %2579 = vtanh.f32 %v991_v15  ;;  %v1949_v20 = vmul.f32 -1.442695, %v991_v15 }
 0xbdf   :  { %2581 = vpow2.f32 %v1951_v19 }
 0xbe0   :  { %2583 = vpow2.f32 %v1949_v20 }
 0xbe4   :  { %v2578_v17 = vpop.eup %2577 }
 0xbe5   :  { %1101 = vrot.lane.b32.xlu1 %v2578_v17, %s2652_s21 }
 0xbe8   :  { %v2580_v18 = vpop.eup %2579 }
 0xbe9   :  { %1003 = vrot.lane.b32.xlu0 %v2580_v18, %s2652_s21  ;;  %v2582_v54 = vpop.eup %2581 }
 0xbea   :  { %v1095_v21 = vadd.f32 1.0, %v2582_v54  ;;  %v2584_v22 = vpop.eup %2583 }
 0xbeb   :  { %v997_v23 = vadd.f32 1.0, %v2584_v22 }
 0xbec   :  { %2585 = vrcp.f32 %v1095_v21 }
 0xbed   :  { %2587 = vrcp.f32 %v997_v23 }
 0xbf6   :  { %v2586_v24 = vpop.eup %2585 }
 0xbf7   :  { %v2588_v27 = vpop.eup %2587  ;;  %v1099_v31 = vmul.f32 %v2586_v24, %v2944_v50 }
 0xbf8   :  { %v1001_v33 = vmul.f32 %v2588_v27, %v2948_v58 }
 0xc57   :  { %v1102_v25 = vpop.permute.xlu1 %1101 }
 0xc58   :  { %v1104_v26 = vmul.f32 %v2586_v24, %v1102_v25 }
 0xc5a   :  { %1106 = vrot.lane.b32.xlu1 %v1104_v26, %s2653_s2 }
 0xc5b   :  { %v1004_v28 = vpop.permute.xlu0 %1003 }
 0xc5c   :  { %v1006_v30 = vmul.f32 %v2588_v27, %v1004_v28 }
 0xc5e   :  { %1008 = vrot.lane.b32.xlu0 %v1006_v30, %s2653_s2 }
 0xccc   :  { %v1107_v32 = vpop.permute.xlu1 %1106 }
 0xccd   :  { %v2982_v29 = vadd.f32 %v1107_v32, %v1099_v31 }
 0xccf   :  { %2589 = vtanh.f32 %v2982_v29 }
 0xcd0   :  { %v1009_v34 = vpop.permute.xlu0 %1008 }
 0xcd1   :  { %v2986_v51 = vadd.f32 %v1009_v34, %v1001_v33 }
 0xcd3   :  { %2591 = vtanh.f32 %v2986_v51 }
 0xcd9   :  { %v2590_v35 = vpop.eup %2589 }
 0xcda   :  { %1112 = vrot.lane.b32.xlu1 %v2590_v35, %s2652_s21 }
 0xcdd   :  { %v2592_v37 = vpop.eup %2591 }
 0xcde   :  { %1014 = vrot.lane.b32.xlu0 %v2592_v37, %s2652_s21 }
 0xd4c   :  { %v1113_v38 = vpop.permute.xlu1 %1112 }
 0xd4d   :  { %v1115_v40 = vmul.f32 %v2586_v24, %v1113_v38 }
 0xd4f   :  { %1117 = vrot.lane.b32.xlu0 %v1115_v40, %s2653_s2 }
 0xd50   :  { %v1015_v41 = vpop.permute.xlu0 %1014 }
 0xd51   :  { %v1017_v42 = vmul.f32 %v2588_v27, %v1015_v41 }
 0xd53   :  { %1121 = vrot.lane.b32.xlu1 %v1017_v42, %s2652_s21 }
 0xdc1   :  { %v1118_v43 = vpop.permute.xlu0 %1117 }
 0xdc2   :  { %2270 = vmatmul.mubr.msk.f32.vlgmr.msra.gmra.mrb[10].mxu1 %vm198_vm2, %v1118_v43 }
 0xdc3   :  { %2464 = vmatpush3.bf16.msra.mxu1 %v2776_v36  ;;  %2288 = vmatprep.mubr.msk.f32.mxu1 %vm2650_vm1, %v2651_v4 }
 0xdc4   :  { %2465 = vmatprep.subr.bf16.mxu1 %v2649_v0 }
 0xdc5   :  { %v1122_v45 = vpop.permute.xlu1 %1121 }
 0xdc6   :  { %v1124_v46 = vsel %vm198_vm2, %v1118_v43, %v1122_v45 }
 0xdc7   :  { %2467 = vmatpush3.bf16.msra.mxu1 %v2787_v39  ;;  %2259 = vmatmul.mubr.msk.f32.vlgmr.msra.gmra.mrb[16].mxu0 %vm308_vm3, %v1124_v46 }
 0xdc8   :  { %2468 = vmatprep.subr.bf16.mxu1 %v2649_v0  ;;  %2476 = vmatpush3.bf16.msra.mxu0 %v2717_v8 }
 0xdc9   :  { %2299 = vmatprep.mubr.msk.f32.mxu0 %vm2650_vm1, %v2651_v4  ;;  %2477 = vmatprep.subr.bf16.mxu0 %v2649_v0 }
 0xdcb   :  { %2470 = vmatpush3.bf16.msra.mxu1 %v2805_v44 }
 0xdcc   :  { %2471 = vmatprep.subr.bf16.mxu1 %v2649_v0  ;;  %2479 = vmatpush3.bf16.msra.mxu0 %v2730_v12 }
 0xdcd   :  { %2480 = vmatprep.subr.bf16.mxu0 %v2649_v0 }
 0xdcf   :  { %2473 = vmatpush3.bf16.msra.mxu1 %v2819_v48 }
 0xdd0   :  { %2492 = vmatprep.subr.bf16.mxu1 %v2649_v0 }
 0xe95   :  { %v1291_v49 = vpop.f32.mrb[10].mxu1 }
 0xe96   :  { %v1295_v50 = vadd.f32 %v1291_v49, %v163_v47  ;;  %v2271_v57 = vpop.f32.mrb[11].mxu1 }
 0xe98   :  { %2593 = vtanh.f32 %v1295_v50  ;;  %v1955_v63 = vmul.f32 -1.442695, %v1295_v50 }
 0xe9a   :  { %v1194_v52 = vpop.f32.mrb[16].mxu0 }
 0xe9b   :  { %v1195_v58 = vadd.f32 %v2861_v60, %v1194_v52  ;;  %v2260_v59 = vpop.f32.mrb[17].mxu0 }
 0xe9d   :  { %2595 = vtanh.f32 %v1195_v58  ;;  %v1953_v1 = vmul.f32 -1.442695, %v1195_v58 }
 0xe9e   :  { %2597 = vpow2.f32 %v1955_v63 }
 0xe9f   :  { %2599 = vpow2.f32 %v1953_v1 }
 0xea2   :  { %v2594_v61 = vpop.eup %2593 }
 0xea3   :  { %1305 = vrot.lane.b32.xlu1 %v2594_v61, %s2652_s21 }
 0xea7   :  { %v2596_v62 = vpop.eup %2595 }
 0xea8   :  { %1207 = vrot.lane.b32.xlu0 %v2596_v62, %s2652_s21  ;;  %v2598_v53 = vpop.eup %2597 }
 0xea9   :  { %v1299_v2 = vadd.f32 1.0, %v2598_v53  ;;  %v2600_v3 = vpop.eup %2599 }
 0xeaa   :  { %v1201_v5 = vadd.f32 1.0, %v2600_v3 }
 0xeab   :  { %2601 = vrcp.f32 %v1299_v2 }
 0xeac   :  { %2603 = vrcp.f32 %v1201_v5 }
 0xeb5   :  { %v2602_v6 = vpop.eup %2601 }
 0xeb6   :  { %v2604_v10 = vpop.eup %2603  ;;  %v1303_v15 = vmul.f32 %v2602_v6, %v2982_v29 }
 0xeb7   :  { %v1205_v18 = vmul.f32 %v2604_v10, %v2986_v51 }
 0xf15   :  { %v1306_v7 = vpop.permute.xlu1 %1305 }
 0xf16   :  { %v1308_v9 = vmul.f32 %v2602_v6, %v1306_v7 }
 0xf18   :  { %1310 = vrot.lane.b32.xlu1 %v1308_v9, %s2653_s2 }
 0xf1a   :  { %v1208_v11 = vpop.permute.xlu0 %1207 }
 0xf1b   :  { %v1210_v14 = vmul.f32 %v2604_v10, %v1208_v11 }
 0xf1d   :  { %1212 = vrot.lane.b32.xlu0 %v1210_v14, %s2653_s2 }
 0xf8a   :  { %v1311_v16 = vpop.permute.xlu1 %1310 }
 0xf8b   :  { %v3020_v17 = vadd.f32 %v1311_v16, %v1303_v15 }
 0xf8d   :  { %2605 = vtanh.f32 %v3020_v17 }
 0xf8f   :  { %v1213_v19 = vpop.permute.xlu0 %1212 }
 0xf90   :  { %v3024_v20 = vadd.f32 %v1213_v19, %v1205_v18 }
 0xf92   :  { %2607 = vtanh.f32 %v3024_v20 }
 0xf97   :  { %v2606_v54 = vpop.eup %2605 }
 0xf98   :  { %1316 = vrot.lane.b32.xlu1 %v2606_v54, %s2652_s21 }
 0xf9c   :  { %v2608_v21 = vpop.eup %2607 }
 0xf9d   :  { %1218 = vrot.lane.b32.xlu0 %v2608_v21, %s2652_s21 }
0x100a   :  { %v1317_v22 = vpop.permute.xlu1 %1316 }
0x100b   :  { %v1319_v23 = vmul.f32 %v2602_v6, %v1317_v22 }
0x100d   :  { %1321 = vrot.lane.b32.xlu0 %v1319_v23, %s2653_s2 }
0x100f   :  { %v1219_v24 = vpop.permute.xlu0 %1218 }
0x1010   :  { %v1221_v25 = vmul.f32 %v2604_v10, %v1219_v24 }
0x1012   :  { %1325 = vrot.lane.b32.xlu1 %v1221_v25, %s2652_s21 }
0x107f   :  { %v1322_v26 = vpop.permute.xlu0 %1321 }
0x1080   :  { %2300 = vmatmul.mubr.msk.f32.vlgmr.msra.gmra.mrb[18].mxu0 %vm198_vm2, %v1322_v26 }
0x1081   :  { %2482 = vmatpush3.bf16.msra.mxu0 %v2776_v36  ;;  %2318 = vmatprep.mubr.msk.f32.mxu0 %vm2650_vm1, %v2651_v4 }
0x1082   :  { %2483 = vmatprep.subr.bf16.mxu0 %v2649_v0 }
0x1084   :  { %v1326_v27 = vpop.permute.xlu1 %1325 }
0x1085   :  { %2485 = vmatpush3.bf16.msra.mxu0 %v2787_v39  ;;  %v1328_v28 = vsel %vm198_vm2, %v1322_v26, %v1326_v27 }
0x1086   :  { %2486 = vmatprep.subr.bf16.mxu0 %v2649_v0  ;;  %2289 = vmatmul.mubr.msk.f32.vlgmr.msra.gmra.mrb[12].mxu1 %vm308_vm3, %v1328_v28 }
0x1087   :  { %2494 = vmatpush3.bf16.msra.mxu1 %v2717_v8  ;;  %2329 = vmatprep.mubr.msk.f32.mxu1 %vm2650_vm1, %v2651_v4  ;;  %v168_v8 = vadd.f32 %v2747_v13, %v2835_v56 }
0x1088   :  { %2495 = vmatprep.subr.bf16.mxu1 %v2649_v0 }
0x1089   :  { %2488 = vmatpush3.bf16.msra.mxu0 %v2805_v44 }
0x108a   :  { %2489 = vmatprep.subr.bf16.mxu0 %v2649_v0 }
0x108b   :  { %2497 = vmatpush3.bf16.msra.mxu1 %v2730_v12 }
0x108c   :  { %2498 = vmatprep.subr.bf16.mxu1 %v2649_v0 }
0x108d   :  { %2491 = vmatpush3.bf16.msra.mxu0 %v2819_v48 }
0x108e   :  { %2510 = vmatprep.subr.bf16.mxu0 %v2649_v0 }
0x1153   :  { %v1495_v30 = vpop.f32.mrb[18].mxu0 }
0x1154   :  { %v1499_v31 = vadd.f32 %v1495_v30, %v168_v8  ;;  %v2301_v32 = vpop.f32.mrb[19].mxu0 }
0x1156   :  { %2609 = vtanh.f32 %v1499_v31  ;;  %v1959_v35 = vmul.f32 -1.442695, %v1499_v31 }
0x1159   :  { %v1398_v29 = vpop.f32.mrb[12].mxu1 }
0x115a   :  { %v1399_v33 = vadd.f32 %v2861_v60, %v1398_v29  ;;  %v2290_v34 = vpop.f32.mrb[13].mxu1 }
0x115c   :  { %2611 = vtanh.f32 %v1399_v33  ;;  %v1957_v37 = vmul.f32 -1.442695, %v1399_v33 }
0x115d   :  { %2613 = vpow2.f32 %v1959_v35 }
0x115e   :  { %2615 = vpow2.f32 %v1957_v37 }
0x1160   :  { %v2610_v51 = vpop.eup %2609 }
0x1161   :  { %1509 = vrot.lane.b32.xlu1 %v2610_v51, %s2652_s21 }
0x1166   :  { %v2612_v12 = vpop.eup %2611 }
0x1167   :  { %1411 = vrot.lane.b32.xlu0 %v2612_v12, %s2652_s21  ;;  %v2614_v56 = vpop.eup %2613 }
0x1168   :  { %v1503_v38 = vadd.f32 1.0, %v2614_v56  ;;  %v2616_v40 = vpop.eup %2615 }
0x1169   :  { %v1405_v41 = vadd.f32 1.0, %v2616_v40 }
0x116a   :  { %2617 = vrcp.f32 %v1503_v38 }
0x116b   :  { %2619 = vrcp.f32 %v1405_v41 }
0x1174   :  { %v2618_v42 = vpop.eup %2617 }
0x1175   :  { %v2620_v46 = vpop.eup %2619  ;;  %v1507_v50 = vmul.f32 %v2618_v42, %v3020_v17 }
0x1176   :  { %v1409_v58 = vmul.f32 %v2620_v46, %v3024_v20 }
0x11d3   :  { %v1510_v43 = vpop.permute.xlu1 %1509 }
0x11d4   :  { %v1512_v45 = vmul.f32 %v2618_v42, %v1510_v43 }
0x11d6   :  { %1514 = vrot.lane.b32.xlu1 %v1512_v45, %s2653_s2 }
0x11d9   :  { %v1412_v47 = vpop.permute.xlu0 %1411 }
0x11da   :  { %v1414_v49 = vmul.f32 %v2620_v46, %v1412_v47 }
0x11dc   :  { %1416 = vrot.lane.b32.xlu0 %v1414_v49, %s2653_s2 }
0x1248   :  { %v1515_v57 = vpop.permute.xlu1 %1514 }
0x1249   :  { %v1517_v52 = vadd.f32 %v1515_v57, %v1507_v50 }
0x124b   :  { %2621 = vtanh.f32 %v1517_v52 }
0x124e   :  { %v1417_v59 = vpop.permute.xlu0 %1416 }
0x124f   :  { %v1419_v61 = vadd.f32 %v1417_v59, %v1409_v58  ;;  %v1836_v58 = vld [vmem:[%s3122_s6 + $0x10] sm:$0xff] }
0x1251   :  { %2623 = vtanh.f32 %v1419_v61 }
0x1255   :  { %v2622_v62 = vpop.eup %2621 }
0x1256   :  { %1520 = vrot.lane.b32.xlu1 %v2622_v62, %s2652_s21 }
0x125b   :  { %v2624_v63 = vpop.eup %2623 }
0x125c   :  { %1422 = vrot.lane.b32.xlu0 %v2624_v63, %s2652_s21 }
0x12c8   :  { %v1521_v1 = vpop.permute.xlu1 %1520 }
0x12c9   :  { %v1523_v53 = vmul.f32 %v2618_v42, %v1521_v1 }
0x12cb   :  { %1525 = vrot.lane.b32.xlu0 %v1523_v53, %s2653_s2 }
0x12ce   :  { %v1423_v2 = vpop.permute.xlu0 %1422 }
0x12cf   :  { %v1425_v3 = vmul.f32 %v2620_v46, %v1423_v2 }
0x12d1   :  { %1529 = vrot.lane.b32.xlu1 %v1425_v3, %s2652_s21  ;;  %v1966_v3 = vld [vmem:[%s3123_s7] ss:$0 sm:$0xff] }
0x133d   :  { %v1526_v5 = vpop.permute.xlu0 %1525 }
0x133e   :  { %2330 = vmatmul.mubr.msk.f32.vlgmr.msra.gmra.mrb[14].mxu1 %vm198_vm2, %v1526_v5 }
0x133f   :  { %2500 = vmatpush3.bf16.msra.mxu1 %v2776_v36  ;;  %2348 = vmatprep.mubr.msk.f32.mxu1 %vm2650_vm1, %v2651_v4  ;;  %v173_v36 = vadd.f32 %v2833_v55, %v2747_v13 }
0x1340   :  { %2501 = vmatprep.subr.bf16.mxu1 %v2649_v0 }
0x1343   :  { %2503 = vmatpush3.bf16.msra.mxu1 %v2787_v39  ;;  %v1530_v6 = vpop.permute.xlu1 %1529 }
0x1344   :  { %2504 = vmatprep.subr.bf16.mxu1 %v2649_v0  ;;  %v1532_v7 = vsel %vm198_vm2, %v1526_v5, %v1530_v6 }
0x1345   :  { %2319 = vmatmul.mubr.msk.f32.vlgmr.msra.gmra.mrb[20].mxu0 %vm308_vm3, %v1532_v7 }
0x1346   :  { %2359 = vmatprep.mubr.msk.f32.mxu0 %vm2650_vm1, %v2651_v4 }
0x1347   :  { %2506 = vmatpush3.bf16.msra.mxu1 %v2805_v44 }
0x1348   :  { %2507 = vmatprep.subr.bf16.mxu1 %v2649_v0 }
0x134b   :  { %2509 = vmatpush3.bf16.msra.mxu1 %v2819_v48 }
0x1411   :  { %v1699_v39 = vpop.f32.mrb[14].mxu1 }
0x1412   :  { %v1703_v9 = vadd.f32 %v1699_v39, %v173_v36  ;;  %v2331_v10 = vpop.f32.mrb[15].mxu1 }
0x1414   :  { %2625 = vtanh.f32 %v1703_v9  ;;  %v1963_v16 = vmul.f32 -1.442695, %v1703_v9 }
0x1418   :  { %v1602_v11 = vpop.f32.mrb[20].mxu0 }
0x1419   :  { %v1603_v14 = vadd.f32 %v2861_v60, %v1602_v11  ;;  %v2320_v15 = vpop.f32.mrb[21].mxu0 }
0x141b   :  { %2627 = vtanh.f32 %v1603_v14  ;;  %v1961_v48 = vmul.f32 -1.442695, %v1603_v14 }
0x141c   :  { %2629 = vpow2.f32 %v1963_v16 }
0x141d   :  { %2631 = vpow2.f32 %v1961_v48 }
0x141e   :  { %v2626_v44 = vpop.eup %2625 }
0x141f   :  { %1713 = vrot.lane.b32.xlu1 %v2626_v44, %s2652_s21 }
0x1425   :  { %v2628_v4 = vpop.eup %2627 }
0x1426   :  { %1615 = vrot.lane.b32.xlu0 %v2628_v4, %s2652_s21  ;;  %v2630_v13 = vpop.eup %2629 }
0x1427   :  { %v1707_v55 = vadd.f32 1.0, %v2630_v13  ;;  %v2632_v17 = vpop.eup %2631 }
0x1428   :  { %v1609_v18 = vadd.f32 1.0, %v2632_v17 }
0x1429   :  { %2633 = vrcp.f32 %v1707_v55 }
0x142a   :  { %2635 = vrcp.f32 %v1609_v18 }
0x1433   :  { %v2634_v19 = vpop.eup %2633 }
0x1434   :  { %v2636_v21 = vpop.eup %2635  ;;  %v1711_v24 = vmul.f32 %v2634_v19, %v1517_v52  ;;  %v1835_v52 = vld [vmem:[%s3122_s6 + $0x8] sm:$0xff] }
0x1435   :  { %v1613_v27 = vmul.f32 %v2636_v21, %v1419_v61  ;;  %v1837_v61 = vld [vmem:[%s3122_s6 + $0x18] sm:$0xff] }
0x1436   :  { %v2514_v62 = vpack.c.bf16 %v1837_v61, %v1836_v58 }
0x1491   :  { %v1714_v20 = vpop.permute.xlu1 %1713 }
0x1492   :  { %v1716_v54 = vmul.f32 %v2634_v19, %v1714_v20 }
0x1494   :  { %1718 = vrot.lane.b32.xlu1 %v1716_v54, %s2653_s2 }
0x1498   :  { %v1616_v22 = vpop.permute.xlu0 %1615 }
0x1499   :  { %v1618_v23 = vmul.f32 %v2636_v21, %v1616_v22 }
0x149b   :  { %1620 = vrot.lane.b32.xlu0 %v1618_v23, %s2653_s2 }
0x1506   :  { %v1719_v25 = vpop.permute.xlu1 %1718 }
0x1507   :  { %v1721_v26 = vadd.f32 %v1719_v25, %v1711_v24 }
0x1509   :  { %2637 = vtanh.f32 %v1721_v26 }
0x150d   :  { %v1621_v28 = vpop.permute.xlu0 %1620 }
0x150e   :  { %v1623_v8 = vadd.f32 %v1621_v28, %v1613_v27 }
0x1510   :  { %2639 = vtanh.f32 %v1623_v8 }
0x1513   :  { %v2638_v30 = vpop.eup %2637 }
0x1514   :  { %1724 = vrot.lane.b32.xlu1 %v2638_v30, %s2652_s21 }
0x151a   :  { %v2640_v31 = vpop.eup %2639 }
0x151b   :  { %1626 = vrot.lane.b32.xlu0 %v2640_v31, %s2652_s21 }
0x1586   :  { %v1725_v32 = vpop.permute.xlu1 %1724 }
0x1587   :  { %v1727_v29 = vmul.f32 %v2634_v19, %v1725_v32 }
0x1589   :  { %1729 = vrot.lane.b32.xlu0 %v1727_v29, %s2653_s2 }
0x158d   :  { %v1627_v33 = vpop.permute.xlu0 %1626 }
0x158e   :  { %v1629_v34 = vmul.f32 %v2636_v21, %v1627_v33 }
0x1590   :  { %1733 = vrot.lane.b32.xlu1 %v1629_v34, %s2652_s21 }
0x15fb   :  { %v1730_v51 = vpop.permute.xlu0 %1729 }
0x1602   :  { %v1734_v12 = vpop.permute.xlu1 %1733 }
0x1603   :  { %v1736_v35 = vsel %vm198_vm2, %v1730_v51, %v1734_v12 }
0x1604   :  { %2349 = vmatmul.mubr.msk.f32.vlgmr.msra.gmra.mrb[16].mxu1 %vm308_vm3, %v1736_v35 }
0x16d7   :  { %v1806_v37 = vpop.f32.mrb[16].mxu1 }
0x16d8   :  { %v1807_v56 = vadd.f32 %v2861_v60, %v1806_v37  ;;  %v2350_v38 = vpop.f32.mrb[17].mxu1  ;;  %v1834_v60 = vld [vmem:[%s3122_s6] sm:$0xff] }
0x16d9   :  { %v2511_v59 = vpack.c.bf16 %v1835_v52, %v1834_v60 }
0x16da   :  { %2641 = vtanh.f32 %v1807_v56  ;;  %v1965_v41 = vmul.f32 -1.442695, %v1807_v56 }
0x16db   :  { %2512 = vmatpush3.bf16.msra.mxu0 %v2511_v59 }
0x16dc   :  { %2643 = vpow2.f32 %v1965_v41  ;;  %2513 = vmatprep.subr.bf16.mxu0 %v2649_v0 }
0x16df   :  { %2515 = vmatpush3.bf16.msra.mxu0 %v2514_v62 }
0x16e4   :  { %v2642_v40 = vpop.eup %2641 }
0x16e5   :  { %1819 = vrot.lane.b32.xlu0 %v2642_v40, %s2652_s21 }
0x16e6   :  { %v2644_v42 = vpop.eup %2643 }
0x16e7   :  { %v1813_v43 = vadd.f32 1.0, %v2644_v42 }
0x16e9   :  { %2645 = vrcp.f32 %v1813_v43 }
0x16f3   :  { %v2646_v45 = vpop.eup %2645 }
0x16f4   :  { %v1817_v49 = vmul.f32 %v2646_v45, %v1623_v8 }
0x1757   :  { %v1820_v46 = vpop.permute.xlu0 %1819 }
0x1758   :  { %v1822_v47 = vmul.f32 %v2646_v45, %v1820_v46 }
0x175a   :  { %1824 = vrot.lane.b32.xlu1 %v1822_v47, %s2653_s2 }
0x17cc   :  { %v1825_v50 = vpop.permute.xlu1 %1824 }
0x17cd   :  { %v1827_v57 = vadd.f32 %v1825_v50, %v1817_v49 }
0x17cf   :  { %2647 = vtanh.f32 %v1827_v57 }
0x17d9   :  { %v2648_v63 = vpop.eup %2647 }
0x17da   :  { %1830 = vrot.lane.b32.xlu0 %v2648_v63, %s2652_s21 }
0x184c   :  { %v1831_v1 = vpop.permute.xlu0 %1830 }
0x184d   :  { %v1833_v53 = vmul.f32 %v2646_v45, %v1831_v1 }
0x184f   :  { %1846 = vrot.lane.b32.xlu1 %v1833_v53, %s2653_s2 }
0x18c1   :  { %v1847_v2 = vpop.permute.xlu1 %1846 }
0x18c2   :  { %2360 = vmatmul.mubr.msk.f32.vlgmr.msra.gmra.mrb[22].mxu0 %vm198_vm2, %v1847_v2 }
0x1995   :  { %v1916_v5 = vpop.f32.mrb[22].mxu0 }
0x1996   :  { %v1917_v6 = vadd.f32 %v1966_v3, %v1916_v5  ;;  %v2361_v7 = vpop.f32.mrb[23].mxu0 }
0x1998   :  { %1920 = vst.msk [vmem:[%s3124_s8] sm:$0xff] %vm46_vm0, %v1917_v6 }

</bundles_post_ra>
